<compile_context>
chip_gen: v7x
topology: tpu7x:2x2x1
jax: 0.10.0
libtpu: 0.0.40
codegen_flags: <defaults>
</compile_context>

<pallas_src>
import functools

import jax
import jax.numpy as jnp
from jax import lax
from jax.experimental import pallas as pl
from jax.experimental.pallas import tpu as pltpu

EMBEDDING_DIM = 32
HIDDEN_SIZE = 64
NUM_CLASSES = 4
VOCAB_SIZE = 20

GATE_PAD = 128   # each LSTM gate padded to a full 128-lane vreg
B_PAD = 8        # batch padded to a full sublane group


def _sigmoid_via_tanh(x):
    # sigmoid(x) == 0.5*tanh(0.5*x) + 0.5 : one EUP op + a VPU fma (VPU has slack).
    return 0.5 * jnp.tanh(0.5 * x) + 0.5


def _lstm_cls_kernel(tok_ref, gt_ref, whh_ref, wout_ref, bout_ref,
                     out_ref, gx_ref, *, seq_len, batch, b_pad):
    """Single-invocation fused embedding-gather + LSTM + classifier.

    tok_ref : (B*T,) int32 SMEM          scalar-prefetched token ids (row-major B,T)
    gt_ref  : (V_pad, 4*GATE_PAD) f32    gate table = embed @ W_ih^T + b, gate-padded
    whh_ref : (GATE_PAD, 4*GATE_PAD) bf16  W_hh^T, gate- and row-padded (pads = 0)
    wout_ref: (GATE_PAD, GATE_PAD) f32   W_out^T padded (only [:H, :4] nonzero)
    bout_ref: (1, GATE_PAD) f32          b_out padded
    out_ref : (B_pad, GATE_PAD) f32      lane-dense logits (valid region [:B, :4])
    gx_ref  : (T*B_pad, 4*GATE_PAD) f32  VMEM scratch for gathered input gates
    """
    GP = GATE_PAD

    # Prologue: zero the scratch (keeps pad batch rows / pad lanes exactly 0),
    # then gather one gate-table row per real (t, b).  Row offsets are static;
    # only the table row index (read from SMEM) is dynamic.  All of this is
    # load/store work off the MXU/EUP serial chain.
    gx_ref[...] = jnp.zeros_like(gx_ref)
    for t in range(seq_len):
        for b in range(batch):
            tok = tok_ref[b * seq_len + t]
            gx_ref[pl.ds(t * b_pad + b, 1), :] = gt_ref[pl.ds(tok, 1), :]

    def step(t, carry):
        h, c = carry                                      # (B_pad, GP) f32 each
        row = pl.multiple_of(t * b_pad, b_pad)            # sublane-aligned
        # Recurrent projection: bf16 operands, f32 accumulation.
        gates = (gx_ref[pl.ds(row, b_pad), :]
                 + jnp.dot(h.astype(whh_ref.dtype), whh_ref[...],
                           preferred_element_type=jnp.float32))   # (B_pad, 4GP)
        # Gate order i, f, g, o (PyTorch LSTM); each slice is a whole 128-lane
        # block -> no XLU lane shuffles on the serial critical path.  Pad lanes
        # see gates == 0 -> i=f=o=0.5, g=0 -> c/h pad lanes stay exactly 0.
        i = _sigmoid_via_tanh(gates[:, 0 * GP:1 * GP])
        f = _sigmoid_via_tanh(gates[:, 1 * GP:2 * GP])
        g = jnp.tanh(gates[:, 2 * GP:3 * GP])
        o = _sigmoid_via_tanh(gates[:, 3 * GP:4 * GP])
        c = f * c + i * g
        h = o * jnp.tanh(c)
        return (h, c)

    zeros = jnp.zeros((b_pad, GP), jnp.float32)
    h, _ = lax.fori_loop(0, seq_len, step, (zeros, zeros), unroll=True)

    # Dropout(p=0.5) is identity in eval mode.
    # TODO(synk): training-mode dropout would need pltpu.prng_seed/prng_random_bits.
    out_ref[...] = (jnp.dot(h, wout_ref[...], preferred_element_type=jnp.float32)
                    + bout_ref[...])


def _gate_pad_cols(m, h, gp):
    """m: (R, 4h) -> (R, 4*gp) with gate k in lanes [k*gp, k*gp + h); pad lanes 0."""
    r = m.shape[0]
    out = jnp.zeros((r, 4 * gp), jnp.float32)
    for k in range(4):
        out = out.at[:, k * gp:k * gp + h].set(
            m[:, k * h:(k + 1) * h].astype(jnp.float32))
    return out


def prepare_params(embed_w, w_ih, w_hh, b_ih, b_hh, w_out, b_out):
    """One-time parameter prep (hoisted out of the per-call path)."""
    H, GP = HIDDEN_SIZE, GATE_PAD
    vocab = embed_w.shape[0]
    vocab_pad = ((vocab + 7) // 8) * 8

    # Fused gate table: row v = embed_w[v] @ W_ih^T + (b_ih + b_hh), gate-padded.
    gt = (embed_w.astype(jnp.float32) @ w_ih.T.astype(jnp.float32)
          + (b_ih + b_hh).astype(jnp.float32))                     # (V, 4H)
    gt_p = jnp.zeros((vocab_pad, 4 * GP), jnp.float32)
    gt_p = gt_p.at[:vocab, :].set(_gate_pad_cols(gt, H, GP))       # (V_pad, 512)

    whh_p = jnp.zeros((GP, 4 * GP), jnp.float32)
    whh_p = whh_p.at[:H, :].set(_gate_pad_cols(w_hh.T, H, GP))     # (128, 512)
    whh_p = whh_p.astype(jnp.bfloat16)    # bf16 MXU operands; accumulation stays f32

    wout_p = jnp.zeros((GP, GP), jnp.float32).at[:H, :NUM_CLASSES].set(
        w_out.T.astype(jnp.float32))                               # (128, 128)
    bout_p = jnp.zeros((1, GP), jnp.float32).at[0, :NUM_CLASSES].set(
        b_out.astype(jnp.float32))                                 # (1, 128)

    return {"gate_table": gt_p, "whh": whh_p, "wout": wout_p, "bout": bout_p}


def rnn_forward(x_tokens, params):
    """x_tokens: (B, T) integer tokens.  Returns logits (B, NUM_CLASSES) f32."""
    B, T = x_tokens.shape
    GP, BP = GATE_PAD, B_PAD
    assert B <= BP, "batch > 8 needs a batch grid axis (see perf notes)"

    gt_p = params["gate_table"]
    vocab_pad = gt_p.shape[0]

    tok_flat = x_tokens.reshape(B * T).astype(jnp.int32)

    kernel = functools.partial(_lstm_cls_kernel, seq_len=T, batch=B, b_pad=BP)

    out = pl.pallas_call(
        kernel,
        out_shape=jax.ShapeDtypeStruct((BP, GP), jnp.float32),
        grid_spec=pltpu.PrefetchScalarGridSpec(
            num_scalar_prefetch=1,                       # token ids -> SMEM
            grid=(1,),
            in_specs=[
                pl.BlockSpec((vocab_pad, 4 * GP), lambda i, tok: (0, 0)),  # gate table
                pl.BlockSpec((GP, 4 * GP), lambda i, tok: (0, 0)),         # W_hh^T bf16
                pl.BlockSpec((GP, GP), lambda i, tok: (0, 0)),             # W_out^T
                pl.BlockSpec((1, GP), lambda i, tok: (0, 0)),              # b_out
            ],
            out_specs=pl.BlockSpec((BP, GP), lambda i, tok: (0, 0)),
            scratch_shapes=[pltpu.VMEM((T * BP, 4 * GP), jnp.float32)],
        ),
        compiler_params=pltpu.CompilerParams(
            dimension_semantics=("arbitrary",)),
    )(tok_flat, gt_p, params["whh"], params["wout"], params["bout"])

    return out[:B, :NUM_CLASSES]


def rnn_reference(x_tokens, embed_w, w_ih, w_hh, b_ih, b_hh, w_out, b_out):
    """Pure-JAX f32 reference (lax.scan LSTM) for verification."""
    H = HIDDEN_SIZE
    B, T = x_tokens.shape
    emb = jnp.take(embed_w, x_tokens, axis=0).astype(jnp.float32)   # (B, T, E)

    def step(carry, x_t):
        h, c = carry
        gates = x_t @ w_ih.T + b_ih + h @ w_hh.T + b_hh
        i = jax.nn.sigmoid(gates[:, 0:H])
        f = jax.nn.sigmoid(gates[:, H:2 * H])
        g = jnp.tanh(gates[:, 2 * H:3 * H])
        o = jax.nn.sigmoid(gates[:, 3 * H:4 * H])
        c = f * c + i * g
        h = o * jnp.tanh(c)
        return (h, c), h

    init = (jnp.zeros((B, H), jnp.float32), jnp.zeros((B, H), jnp.float32))
    (h_last, _), _ = jax.lax.scan(step, init, jnp.transpose(emb, (1, 0, 2)))
    return h_last @ w_out.T + b_out


if __name__ == "__main__":
    B, T = 2, 8
    key = jax.random.PRNGKey(0)
    ks = jax.random.split(key, 8)

    # Deterministic synthetic parameters (shapes match the PyTorch module; the
    # pretrained w2i/weight.npy embedding table is replaced by a synthetic one).
    embed_w = jax.random.normal(ks[0], (VOCAB_SIZE, EMBEDDING_DIM), jnp.float32) * 0.1
    w_ih = jax.random.normal(ks[1], (4 * HIDDEN_SIZE, EMBEDDING_DIM), jnp.float32) * 0.1
    w_hh = jax.random.normal(ks[2], (4 * HIDDEN_SIZE, HIDDEN_SIZE), jnp.float32) * 0.1
    b_ih = jax.random.normal(ks[3], (4 * HIDDEN_SIZE,), jnp.float32) * 0.1
    b_hh = jax.random.normal(ks[4], (4 * HIDDEN_SIZE,), jnp.float32) * 0.1
    w_out = jax.random.normal(ks[5], (NUM_CLASSES, HIDDEN_SIZE), jnp.float32) * 0.1
    b_out = jax.random.normal(ks[6], (NUM_CLASSES,), jnp.float32) * 0.1

    x_tokens = jax.random.randint(ks[7], (B, T), 0, VOCAB_SIZE, dtype=jnp.int32)

    # One-time layout/padding/cast prep (hoisted out of the per-call path).
    params = prepare_params(embed_w, w_ih, w_hh, b_ih, b_hh, w_out, b_out)

    out = rnn_forward(x_tokens, params)
    out = jax.block_until_ready(out)

    ref = rnn_reference(x_tokens, embed_w, w_ih, w_hh, b_ih, b_hh, w_out, b_out)
    assert out.shape == (B, NUM_CLASSES)
    # bf16 operands in the recurrent matmul (f32 accumulation) -> looser tolerance.
    assert jnp.allclose(out, ref, atol=1e-2, rtol=1e-2)

    print("KERNEL_OK")
</pallas_src>

<mosaic_0001>
module attributes {stable_mosaic.version = 11 : i64} {
  func.func @_lstm_cls_kernel(%arg0: i32, %arg1: memref<16xi32, #tpu.memory_space<smem>>, %arg2: memref<24x512xf32, #tpu.memory_space<vmem>>, %arg3: memref<128x512xbf16, #tpu.memory_space<vmem>>, %arg4: memref<128x128xf32, #tpu.memory_space<vmem>>, %arg5: memref<1x128xf32, #tpu.memory_space<vmem>>, %arg6: memref<8x128xf32, #tpu.memory_space<vmem>>, %arg7: memref<64x512xf32, #tpu.memory_space<vmem>>) attributes {dimension_semantics = [#tpu.dimension_semantics<arbitrary>], iteration_bounds = array<i64: 1>, scalar_prefetch = 1 : i64, scratch_operands = 1 : i64, tpu.core_type = #tpu.core_type<tc>, window_params = [{pipeline_mode = #tpu.pipeline_mode<synchronous>, transform_indices = @transform_0, window_bounds = array<i64: 24, 512>}, {pipeline_mode = #tpu.pipeline_mode<synchronous>, transform_indices = @transform_1, window_bounds = array<i64: 128, 512>}, {pipeline_mode = #tpu.pipeline_mode<synchronous>, transform_indices = @transform_2, window_bounds = array<i64: 128, 128>}, {pipeline_mode = #tpu.pipeline_mode<synchronous>, transform_indices = @transform_3, window_bounds = array<i64: 1, 128>}, {pipeline_mode = #tpu.pipeline_mode<synchronous>, transform_indices = @transform_4, window_bounds = array<i64: 8, 128>}]} {
    %cst = arith.constant 0.000000e+00 : f32
    %0 = vector.broadcast %cst : f32 to vector<64x512xf32>
    %c0 = arith.constant 0 : index
    %c0_0 = arith.constant 0 : index
    %1 = vector.load %arg7[%c0, %c0_0] : memref<64x512xf32, #tpu.memory_space<vmem>>, vector<64x512xf32>
    tpu.vector_store %arg7[%c0, %c0_0], %0 {strides = array<i32>} : memref<64x512xf32, #tpu.memory_space<vmem>>, vector<64x512xf32>,
    %c0_1 = arith.constant 0 : index
    %2 = memref.load %arg1[%c0_1] : memref<16xi32, #tpu.memory_space<smem>>
    %3 = arith.index_cast %2 : i32 to index
    %c0_2 = arith.constant 0 : index
    %4 = vector.load %arg2[%3, %c0_2] : memref<24x512xf32, #tpu.memory_space<vmem>>, vector<1x512xf32>
    %c0_3 = arith.constant 0 : index
    %c0_4 = arith.constant 0 : index
    %5 = vector.load %arg7[%c0_3, %c0_4] : memref<64x512xf32, #tpu.memory_space<vmem>>, vector<1x512xf32>
    tpu.vector_store %arg7[%c0_3, %c0_4], %4 {strides = array<i32>} : memref<64x512xf32, #tpu.memory_space<vmem>>, vector<1x512xf32>,
    %c8 = arith.constant 8 : index
    %6 = memref.load %arg1[%c8] : memref<16xi32, #tpu.memory_space<smem>>
    %7 = arith.index_cast %6 : i32 to index
    %c0_5 = arith.constant 0 : index
    %8 = vector.load %arg2[%7, %c0_5] : memref<24x512xf32, #tpu.memory_space<vmem>>, vector<1x512xf32>
    %c1 = arith.constant 1 : index
    %c0_6 = arith.constant 0 : index
    %9 = vector.load %arg7[%c1, %c0_6] : memref<64x512xf32, #tpu.memory_space<vmem>>, vector<1x512xf32>
    tpu.vector_store %arg7[%c1, %c0_6], %8 {strides = array<i32>} : memref<64x512xf32, #tpu.memory_space<vmem>>, vector<1x512xf32>,
    %c1_7 = arith.constant 1 : index
    %10 = memref.load %arg1[%c1_7] : memref<16xi32, #tpu.memory_space<smem>>
    %11 = arith.index_cast %10 : i32 to index
    %c0_8 = arith.constant 0 : index
    %12 = vector.load %arg2[%11, %c0_8] : memref<24x512xf32, #tpu.memory_space<vmem>>, vector<1x512xf32>
    %c8_9 = arith.constant 8 : index
    %c0_10 = arith.constant 0 : index
    %13 = vector.load %arg7[%c8_9, %c0_10] : memref<64x512xf32, #tpu.memory_space<vmem>>, vector<1x512xf32>
    tpu.vector_store %arg7[%c8_9, %c0_10], %12 {strides = array<i32>} : memref<64x512xf32, #tpu.memory_space<vmem>>, vector<1x512xf32>,
    %c9 = arith.constant 9 : index
    %14 = memref.load %arg1[%c9] : memref<16xi32, #tpu.memory_space<smem>>
    %15 = arith.index_cast %14 : i32 to index
    %c0_11 = arith.constant 0 : index
    %16 = vector.load %arg2[%15, %c0_11] : memref<24x512xf32, #tpu.memory_space<vmem>>, vector<1x512xf32>
    %c9_12 = arith.constant 9 : index
    %c0_13 = arith.constant 0 : index
    %17 = vector.load %arg7[%c9_12, %c0_13] : memref<64x512xf32, #tpu.memory_space<vmem>>, vector<1x512xf32>
    tpu.vector_store %arg7[%c9_12, %c0_13], %16 {strides = array<i32>} : memref<64x512xf32, #tpu.memory_space<vmem>>, vector<1x512xf32>,
    %c2 = arith.constant 2 : index
    %18 = memref.load %arg1[%c2] : memref<16xi32, #tpu.memory_space<smem>>
    %19 = arith.index_cast %18 : i32 to index
    %c0_14 = arith.constant 0 : index
    %20 = vector.load %arg2[%19, %c0_14] : memref<24x512xf32, #tpu.memory_space<vmem>>, vector<1x512xf32>
    %c16 = arith.constant 16 : index
    %c0_15 = arith.constant 0 : index
    %21 = vector.load %arg7[%c16, %c0_15] : memref<64x512xf32, #tpu.memory_space<vmem>>, vector<1x512xf32>
    tpu.vector_store %arg7[%c16, %c0_15], %20 {strides = array<i32>} : memref<64x512xf32, #tpu.memory_space<vmem>>, vector<1x512xf32>,
    %c10 = arith.constant 10 : index
    %22 = memref.load %arg1[%c10] : memref<16xi32, #tpu.memory_space<smem>>
    %23 = arith.index_cast %22 : i32 to index
    %c0_16 = arith.constant 0 : index
    %24 = vector.load %arg2[%23, %c0_16] : memref<24x512xf32, #tpu.memory_space<vmem>>, vector<1x512xf32>
    %c17 = arith.constant 17 : index
    %c0_17 = arith.constant 0 : index
    %25 = vector.load %arg7[%c17, %c0_17] : memref<64x512xf32, #tpu.memory_space<vmem>>, vector<1x512xf32>
    tpu.vector_store %arg7[%c17, %c0_17], %24 {strides = array<i32>} : memref<64x512xf32, #tpu.memory_space<vmem>>, vector<1x512xf32>,
    %c3 = arith.constant 3 : index
    %26 = memref.load %arg1[%c3] : memref<16xi32, #tpu.memory_space<smem>>
    %27 = arith.index_cast %26 : i32 to index
    %c0_18 = arith.constant 0 : index
    %28 = vector.load %arg2[%27, %c0_18] : memref<24x512xf32, #tpu.memory_space<vmem>>, vector<1x512xf32>
    %c24 = arith.constant 24 : index
    %c0_19 = arith.constant 0 : index
    %29 = vector.load %arg7[%c24, %c0_19] : memref<64x512xf32, #tpu.memory_space<vmem>>, vector<1x512xf32>
    tpu.vector_store %arg7[%c24, %c0_19], %28 {strides = array<i32>} : memref<64x512xf32, #tpu.memory_space<vmem>>, vector<1x512xf32>,
    %c11 = arith.constant 11 : index
    %30 = memref.load %arg1[%c11] : memref<16xi32, #tpu.memory_space<smem>>
    %31 = arith.index_cast %30 : i32 to index
    %c0_20 = arith.constant 0 : index
    %32 = vector.load %arg2[%31, %c0_20] : memref<24x512xf32, #tpu.memory_space<vmem>>, vector<1x512xf32>
    %c25 = arith.constant 25 : index
    %c0_21 = arith.constant 0 : index
    %33 = vector.load %arg7[%c25, %c0_21] : memref<64x512xf32, #tpu.memory_space<vmem>>, vector<1x512xf32>
    tpu.vector_store %arg7[%c25, %c0_21], %32 {strides = array<i32>} : memref<64x512xf32, #tpu.memory_space<vmem>>, vector<1x512xf32>,
    %c4 = arith.constant 4 : index
    %34 = memref.load %arg1[%c4] : memref<16xi32, #tpu.memory_space<smem>>
    %35 = arith.index_cast %34 : i32 to index
    %c0_22 = arith.constant 0 : index
    %36 = vector.load %arg2[%35, %c0_22] : memref<24x512xf32, #tpu.memory_space<vmem>>, vector<1x512xf32>
    %c32 = arith.constant 32 : index
    %c0_23 = arith.constant 0 : index
    %37 = vector.load %arg7[%c32, %c0_23] : memref<64x512xf32, #tpu.memory_space<vmem>>, vector<1x512xf32>
    tpu.vector_store %arg7[%c32, %c0_23], %36 {strides = array<i32>} : memref<64x512xf32, #tpu.memory_space<vmem>>, vector<1x512xf32>,
    %c12 = arith.constant 12 : index
    %38 = memref.load %arg1[%c12] : memref<16xi32, #tpu.memory_space<smem>>
    %39 = arith.index_cast %38 : i32 to index
    %c0_24 = arith.constant 0 : index
    %40 = vector.load %arg2[%39, %c0_24] : memref<24x512xf32, #tpu.memory_space<vmem>>, vector<1x512xf32>
    %c33 = arith.constant 33 : index
    %c0_25 = arith.constant 0 : index
    %41 = vector.load %arg7[%c33, %c0_25] : memref<64x512xf32, #tpu.memory_space<vmem>>, vector<1x512xf32>
    tpu.vector_store %arg7[%c33, %c0_25], %40 {strides = array<i32>} : memref<64x512xf32, #tpu.memory_space<vmem>>, vector<1x512xf32>,
    %c5 = arith.constant 5 : index
    %42 = memref.load %arg1[%c5] : memref<16xi32, #tpu.memory_space<smem>>
    %43 = arith.index_cast %42 : i32 to index
    %c0_26 = arith.constant 0 : index
    %44 = vector.load %arg2[%43, %c0_26] : memref<24x512xf32, #tpu.memory_space<vmem>>, vector<1x512xf32>
    %c40 = arith.constant 40 : index
    %c0_27 = arith.constant 0 : index
    %45 = vector.load %arg7[%c40, %c0_27] : memref<64x512xf32, #tpu.memory_space<vmem>>, vector<1x512xf32>
    tpu.vector_store %arg7[%c40, %c0_27], %44 {strides = array<i32>} : memref<64x512xf32, #tpu.memory_space<vmem>>, vector<1x512xf32>,
    %c13 = arith.constant 13 : index
    %46 = memref.load %arg1[%c13] : memref<16xi32, #tpu.memory_space<smem>>
    %47 = arith.index_cast %46 : i32 to index
    %c0_28 = arith.constant 0 : index
    %48 = vector.load %arg2[%47, %c0_28] : memref<24x512xf32, #tpu.memory_space<vmem>>, vector<1x512xf32>
    %c41 = arith.constant 41 : index
    %c0_29 = arith.constant 0 : index
    %49 = vector.load %arg7[%c41, %c0_29] : memref<64x512xf32, #tpu.memory_space<vmem>>, vector<1x512xf32>
    tpu.vector_store %arg7[%c41, %c0_29], %48 {strides = array<i32>} : memref<64x512xf32, #tpu.memory_space<vmem>>, vector<1x512xf32>,
    %c6 = arith.constant 6 : index
    %50 = memref.load %arg1[%c6] : memref<16xi32, #tpu.memory_space<smem>>
    %51 = arith.index_cast %50 : i32 to index
    %c0_30 = arith.constant 0 : index
    %52 = vector.load %arg2[%51, %c0_30] : memref<24x512xf32, #tpu.memory_space<vmem>>, vector<1x512xf32>
    %c48 = arith.constant 48 : index
    %c0_31 = arith.constant 0 : index
    %53 = vector.load %arg7[%c48, %c0_31] : memref<64x512xf32, #tpu.memory_space<vmem>>, vector<1x512xf32>
    tpu.vector_store %arg7[%c48, %c0_31], %52 {strides = array<i32>} : memref<64x512xf32, #tpu.memory_space<vmem>>, vector<1x512xf32>,
    %c14 = arith.constant 14 : index
    %54 = memref.load %arg1[%c14] : memref<16xi32, #tpu.memory_space<smem>>
    %55 = arith.index_cast %54 : i32 to index
    %c0_32 = arith.constant 0 : index
    %56 = vector.load %arg2[%55, %c0_32] : memref<24x512xf32, #tpu.memory_space<vmem>>, vector<1x512xf32>
    %c49 = arith.constant 49 : index
    %c0_33 = arith.constant 0 : index
    %57 = vector.load %arg7[%c49, %c0_33] : memref<64x512xf32, #tpu.memory_space<vmem>>, vector<1x512xf32>
    tpu.vector_store %arg7[%c49, %c0_33], %56 {strides = array<i32>} : memref<64x512xf32, #tpu.memory_space<vmem>>, vector<1x512xf32>,
    %c7 = arith.constant 7 : index
    %58 = memref.load %arg1[%c7] : memref<16xi32, #tpu.memory_space<smem>>
    %59 = arith.index_cast %58 : i32 to index
    %c0_34 = arith.constant 0 : index
    %60 = vector.load %arg2[%59, %c0_34] : memref<24x512xf32, #tpu.memory_space<vmem>>, vector<1x512xf32>
    %c56 = arith.constant 56 : index
    %c0_35 = arith.constant 0 : index
    %61 = vector.load %arg7[%c56, %c0_35] : memref<64x512xf32, #tpu.memory_space<vmem>>, vector<1x512xf32>
    tpu.vector_store %arg7[%c56, %c0_35], %60 {strides = array<i32>} : memref<64x512xf32, #tpu.memory_space<vmem>>, vector<1x512xf32>,
    %c15 = arith.constant 15 : index
    %62 = memref.load %arg1[%c15] : memref<16xi32, #tpu.memory_space<smem>>
    %63 = arith.index_cast %62 : i32 to index
    %c0_36 = arith.constant 0 : index
    %64 = vector.load %arg2[%63, %c0_36] : memref<24x512xf32, #tpu.memory_space<vmem>>, vector<1x512xf32>
    %c57 = arith.constant 57 : index
    %c0_37 = arith.constant 0 : index
    %65 = vector.load %arg7[%c57, %c0_37] : memref<64x512xf32, #tpu.memory_space<vmem>>, vector<1x512xf32>
    tpu.vector_store %arg7[%c57, %c0_37], %64 {strides = array<i32>} : memref<64x512xf32, #tpu.memory_space<vmem>>, vector<1x512xf32>,
    %cst_38 = arith.constant 0.000000e+00 : f32
    %66 = vector.broadcast %cst_38 : f32 to vector<8x128xf32>
    %c0_i32 = arith.constant 0 : i32
    %c8_i32 = arith.constant 8 : i32
    %67 = arith.muli %c0_i32, %c8_i32 : i32
    %68 = tpu.assume_multiple %67, 8 : i32
    %69 = arith.index_cast %68 : i32 to index
    %c0_39 = arith.constant 0 : index
    %70 = vector.load %arg7[%69, %c0_39] : memref<64x512xf32, #tpu.memory_space<vmem>>, vector<8x512xf32>
    %71 = arith.truncf %66 : vector<8x128xf32> to vector<8x128xbf16>
    %c0_40 = arith.constant 0 : index
    %c0_41 = arith.constant 0 : index
    %72 = vector.load %arg3[%c0_40, %c0_41] : memref<128x512xbf16, #tpu.memory_space<vmem>>, vector<128x512xbf16>
    %cst_42 = arith.constant dense<0.000000e+00> : vector<8x512xf32>
    %73 = tpu.matmul %71, %72, %cst_42 {dimension_numbers = #tpu.dot_dimension_numbers<[1], [0], [0], [1], [0, 0, 1, 1], [], []>} : vector<8x128xbf16>, vector<128x512xbf16>, vector<8x512xf32> -> vector<8x512xf32>
    %74 = arith.addf %70, %73 : vector<8x512xf32>
    %75 = vector.extract_strided_slice %74 {offsets = [0, 0], sizes = [8, 128], strides = [1, 1]} : vector<8x512xf32> to vector<8x128xf32>
    %cst_43 = arith.constant 5.000000e-01 : f32
    %76 = vector.broadcast %cst_43 : f32 to vector<8x128xf32>
    %77 = arith.mulf %76, %75 : vector<8x128xf32>
    %78 = math.tanh %77 : vector<8x128xf32>
    %cst_44 = arith.constant 5.000000e-01 : f32
    %79 = vector.broadcast %cst_44 : f32 to vector<8x128xf32>
    %80 = arith.mulf %79, %78 : vector<8x128xf32>
    %cst_45 = arith.constant 5.000000e-01 : f32
    %81 = vector.broadcast %cst_45 : f32 to vector<8x128xf32>
    %82 = arith.addf %80, %81 : vector<8x128xf32>
    %83 = vector.extract_strided_slice %74 {offsets = [0, 128], sizes = [8, 128], strides = [1, 1]} : vector<8x512xf32> to vector<8x128xf32>
    %cst_46 = arith.constant 5.000000e-01 : f32
    %84 = vector.broadcast %cst_46 : f32 to vector<8x128xf32>
    %85 = arith.mulf %84, %83 : vector<8x128xf32>
    %86 = math.tanh %85 : vector<8x128xf32>
    %cst_47 = arith.constant 5.000000e-01 : f32
    %87 = vector.broadcast %cst_47 : f32 to vector<8x128xf32>
    %88 = arith.mulf %87, %86 : vector<8x128xf32>
    %cst_48 = arith.constant 5.000000e-01 : f32
    %89 = vector.broadcast %cst_48 : f32 to vector<8x128xf32>
    %90 = arith.addf %88, %89 : vector<8x128xf32>
    %91 = vector.extract_strided_slice %74 {offsets = [0, 256], sizes = [8, 128], strides = [1, 1]} : vector<8x512xf32> to vector<8x128xf32>
    %92 = math.tanh %91 : vector<8x128xf32>
    %93 = vector.extract_strided_slice %74 {offsets = [0, 384], sizes = [8, 128], strides = [1, 1]} : vector<8x512xf32> to vector<8x128xf32>
    %cst_49 = arith.constant 5.000000e-01 : f32
    %94 = vector.broadcast %cst_49 : f32 to vector<8x128xf32>
    %95 = arith.mulf %94, %93 : vector<8x128xf32>
    %96 = math.tanh %95 : vector<8x128xf32>
    %cst_50 = arith.constant 5.000000e-01 : f32
    %97 = vector.broadcast %cst_50 : f32 to vector<8x128xf32>
    %98 = arith.mulf %97, %96 : vector<8x128xf32>
    %cst_51 = arith.constant 5.000000e-01 : f32
    %99 = vector.broadcast %cst_51 : f32 to vector<8x128xf32>
    %100 = arith.addf %98, %99 : vector<8x128xf32>
    %101 = arith.mulf %90, %66 : vector<8x128xf32>
    %102 = arith.mulf %82, %92 : vector<8x128xf32>
    %103 = arith.addf %101, %102 : vector<8x128xf32>
    %104 = math.tanh %103 : vector<8x128xf32>
    %105 = arith.mulf %100, %104 : vector<8x128xf32>
    %c1_i32 = arith.constant 1 : i32
    %c8_i32_52 = arith.constant 8 : i32
    %106 = arith.muli %c1_i32, %c8_i32_52 : i32
    %107 = tpu.assume_multiple %106, 8 : i32
    %108 = arith.index_cast %107 : i32 to index
    %c0_53 = arith.constant 0 : index
    %109 = vector.load %arg7[%108, %c0_53] : memref<64x512xf32, #tpu.memory_space<vmem>>, vector<8x512xf32>
    %110 = arith.truncf %105 : vector<8x128xf32> to vector<8x128xbf16>
    %c0_54 = arith.constant 0 : index
    %c0_55 = arith.constant 0 : index
    %111 = vector.load %arg3[%c0_54, %c0_55] : memref<128x512xbf16, #tpu.memory_space<vmem>>, vector<128x512xbf16>
    %cst_56 = arith.constant dense<0.000000e+00> : vector<8x512xf32>
    %112 = tpu.matmul %110, %111, %cst_56 {dimension_numbers = #tpu.dot_dimension_numbers<[1], [0], [0], [1], [0, 0, 1, 1], [], []>} : vector<8x128xbf16>, vector<128x512xbf16>, vector<8x512xf32> -> vector<8x512xf32>
    %113 = arith.addf %109, %112 : vector<8x512xf32>
    %114 = vector.extract_strided_slice %113 {offsets = [0, 0], sizes = [8, 128], strides = [1, 1]} : vector<8x512xf32> to vector<8x128xf32>
    %cst_57 = arith.constant 5.000000e-01 : f32
    %115 = vector.broadcast %cst_57 : f32 to vector<8x128xf32>
    %116 = arith.mulf %115, %114 : vector<8x128xf32>
    %117 = math.tanh %116 : vector<8x128xf32>
    %cst_58 = arith.constant 5.000000e-01 : f32
    %118 = vector.broadcast %cst_58 : f32 to vector<8x128xf32>
    %119 = arith.mulf %118, %117 : vector<8x128xf32>
    %cst_59 = arith.constant 5.000000e-01 : f32
    %120 = vector.broadcast %cst_59 : f32 to vector<8x128xf32>
    %121 = arith.addf %119, %120 : vector<8x128xf32>
    %122 = vector.extract_strided_slice %113 {offsets = [0, 128], sizes = [8, 128], strides = [1, 1]} : vector<8x512xf32> to vector<8x128xf32>
    %cst_60 = arith.constant 5.000000e-01 : f32
    %123 = vector.broadcast %cst_60 : f32 to vector<8x128xf32>
    %124 = arith.mulf %123, %122 : vector<8x128xf32>
    %125 = math.tanh %124 : vector<8x128xf32>
    %cst_61 = arith.constant 5.000000e-01 : f32
    %126 = vector.broadcast %cst_61 : f32 to vector<8x128xf32>
    %127 = arith.mulf %126, %125 : vector<8x128xf32>
    %cst_62 = arith.constant 5.000000e-01 : f32
    %128 = vector.broadcast %cst_62 : f32 to vector<8x128xf32>
    %129 = arith.addf %127, %128 : vector<8x128xf32>
    %130 = vector.extract_strided_slice %113 {offsets = [0, 256], sizes = [8, 128], strides = [1, 1]} : vector<8x512xf32> to vector<8x128xf32>
    %131 = math.tanh %130 : vector<8x128xf32>
    %132 = vector.extract_strided_slice %113 {offsets = [0, 384], sizes = [8, 128], strides = [1, 1]} : vector<8x512xf32> to vector<8x128xf32>
    %cst_63 = arith.constant 5.000000e-01 : f32
    %133 = vector.broadcast %cst_63 : f32 to vector<8x128xf32>
    %134 = arith.mulf %133, %132 : vector<8x128xf32>
    %135 = math.tanh %134 : vector<8x128xf32>
    %cst_64 = arith.constant 5.000000e-01 : f32
    %136 = vector.broadcast %cst_64 : f32 to vector<8x128xf32>
    %137 = arith.mulf %136, %135 : vector<8x128xf32>
    %cst_65 = arith.constant 5.000000e-01 : f32
    %138 = vector.broadcast %cst_65 : f32 to vector<8x128xf32>
    %139 = arith.addf %137, %138 : vector<8x128xf32>
    %140 = arith.mulf %129, %103 : vector<8x128xf32>
    %141 = arith.mulf %121, %131 : vector<8x128xf32>
    %142 = arith.addf %140, %141 : vector<8x128xf32>
    %143 = math.tanh %142 : vector<8x128xf32>
    %144 = arith.mulf %139, %143 : vector<8x128xf32>
    %c2_i32 = arith.constant 2 : i32
    %c8_i32_66 = arith.constant 8 : i32
    %145 = arith.muli %c2_i32, %c8_i32_66 : i32
    %146 = tpu.assume_multiple %145, 8 : i32
    %147 = arith.index_cast %146 : i32 to index
    %c0_67 = arith.constant 0 : index
    %148 = vector.load %arg7[%147, %c0_67] : memref<64x512xf32, #tpu.memory_space<vmem>>, vector<8x512xf32>
    %149 = arith.truncf %144 : vector<8x128xf32> to vector<8x128xbf16>
    %c0_68 = arith.constant 0 : index
    %c0_69 = arith.constant 0 : index
    %150 = vector.load %arg3[%c0_68, %c0_69] : memref<128x512xbf16, #tpu.memory_space<vmem>>, vector<128x512xbf16>
    %cst_70 = arith.constant dense<0.000000e+00> : vector<8x512xf32>
    %151 = tpu.matmul %149, %150, %cst_70 {dimension_numbers = #tpu.dot_dimension_numbers<[1], [0], [0], [1], [0, 0, 1, 1], [], []>} : vector<8x128xbf16>, vector<128x512xbf16>, vector<8x512xf32> -> vector<8x512xf32>
    %152 = arith.addf %148, %151 : vector<8x512xf32>
    %153 = vector.extract_strided_slice %152 {offsets = [0, 0], sizes = [8, 128], strides = [1, 1]} : vector<8x512xf32> to vector<8x128xf32>
    %cst_71 = arith.constant 5.000000e-01 : f32
    %154 = vector.broadcast %cst_71 : f32 to vector<8x128xf32>
    %155 = arith.mulf %154, %153 : vector<8x128xf32>
    %156 = math.tanh %155 : vector<8x128xf32>
    %cst_72 = arith.constant 5.000000e-01 : f32
    %157 = vector.broadcast %cst_72 : f32 to vector<8x128xf32>
    %158 = arith.mulf %157, %156 : vector<8x128xf32>
    %cst_73 = arith.constant 5.000000e-01 : f32
    %159 = vector.broadcast %cst_73 : f32 to vector<8x128xf32>
    %160 = arith.addf %158, %159 : vector<8x128xf32>
    %161 = vector.extract_strided_slice %152 {offsets = [0, 128], sizes = [8, 128], strides = [1, 1]} : vector<8x512xf32> to vector<8x128xf32>
    %cst_74 = arith.constant 5.000000e-01 : f32
    %162 = vector.broadcast %cst_74 : f32 to vector<8x128xf32>
    %163 = arith.mulf %162, %161 : vector<8x128xf32>
    %164 = math.tanh %163 : vector<8x128xf32>
    %cst_75 = arith.constant 5.000000e-01 : f32
    %165 = vector.broadcast %cst_75 : f32 to vector<8x128xf32>
    %166 = arith.mulf %165, %164 : vector<8x128xf32>
    %cst_76 = arith.constant 5.000000e-01 : f32
    %167 = vector.broadcast %cst_76 : f32 to vector<8x128xf32>
    %168 = arith.addf %166, %167 : vector<8x128xf32>
    %169 = vector.extract_strided_slice %152 {offsets = [0, 256], sizes = [8, 128], strides = [1, 1]} : vector<8x512xf32> to vector<8x128xf32>
    %170 = math.tanh %169 : vector<8x128xf32>
    %171 = vector.extract_strided_slice %152 {offsets = [0, 384], sizes = [8, 128], strides = [1, 1]} : vector<8x512xf32> to vector<8x128xf32>
    %cst_77 = arith.constant 5.000000e-01 : f32
    %172 = vector.broadcast %cst_77 : f32 to vector<8x128xf32>
    %173 = arith.mulf %172, %171 : vector<8x128xf32>
    %174 = math.tanh %173 : vector<8x128xf32>
    %cst_78 = arith.constant 5.000000e-01 : f32
    %175 = vector.broadcast %cst_78 : f32 to vector<8x128xf32>
    %176 = arith.mulf %175, %174 : vector<8x128xf32>
    %cst_79 = arith.constant 5.000000e-01 : f32
    %177 = vector.broadcast %cst_79 : f32 to vector<8x128xf32>
    %178 = arith.addf %176, %177 : vector<8x128xf32>
    %179 = arith.mulf %168, %142 : vector<8x128xf32>
    %180 = arith.mulf %160, %170 : vector<8x128xf32>
    %181 = arith.addf %179, %180 : vector<8x128xf32>
    %182 = math.tanh %181 : vector<8x128xf32>
    %183 = arith.mulf %178, %182 : vector<8x128xf32>
    %c3_i32 = arith.constant 3 : i32
    %c8_i32_80 = arith.constant 8 : i32
    %184 = arith.muli %c3_i32, %c8_i32_80 : i32
    %185 = tpu.assume_multiple %184, 8 : i32
    %186 = arith.index_cast %185 : i32 to index
    %c0_81 = arith.constant 0 : index
    %187 = vector.load %arg7[%186, %c0_81] : memref<64x512xf32, #tpu.memory_space<vmem>>, vector<8x512xf32>
    %188 = arith.truncf %183 : vector<8x128xf32> to vector<8x128xbf16>
    %c0_82 = arith.constant 0 : index
    %c0_83 = arith.constant 0 : index
    %189 = vector.load %arg3[%c0_82, %c0_83] : memref<128x512xbf16, #tpu.memory_space<vmem>>, vector<128x512xbf16>
    %cst_84 = arith.constant dense<0.000000e+00> : vector<8x512xf32>
    %190 = tpu.matmul %188, %189, %cst_84 {dimension_numbers = #tpu.dot_dimension_numbers<[1], [0], [0], [1], [0, 0, 1, 1], [], []>} : vector<8x128xbf16>, vector<128x512xbf16>, vector<8x512xf32> -> vector<8x512xf32>
    %191 = arith.addf %187, %190 : vector<8x512xf32>
    %192 = vector.extract_strided_slice %191 {offsets = [0, 0], sizes = [8, 128], strides = [1, 1]} : vector<8x512xf32> to vector<8x128xf32>
    %cst_85 = arith.constant 5.000000e-01 : f32
    %193 = vector.broadcast %cst_85 : f32 to vector<8x128xf32>
    %194 = arith.mulf %193, %192 : vector<8x128xf32>
    %195 = math.tanh %194 : vector<8x128xf32>
    %cst_86 = arith.constant 5.000000e-01 : f32
    %196 = vector.broadcast %cst_86 : f32 to vector<8x128xf32>
    %197 = arith.mulf %196, %195 : vector<8x128xf32>
    %cst_87 = arith.constant 5.000000e-01 : f32
    %198 = vector.broadcast %cst_87 : f32 to vector<8x128xf32>
    %199 = arith.addf %197, %198 : vector<8x128xf32>
    %200 = vector.extract_strided_slice %191 {offsets = [0, 128], sizes = [8, 128], strides = [1, 1]} : vector<8x512xf32> to vector<8x128xf32>
    %cst_88 = arith.constant 5.000000e-01 : f32
    %201 = vector.broadcast %cst_88 : f32 to vector<8x128xf32>
    %202 = arith.mulf %201, %200 : vector<8x128xf32>
    %203 = math.tanh %202 : vector<8x128xf32>
    %cst_89 = arith.constant 5.000000e-01 : f32
    %204 = vector.broadcast %cst_89 : f32 to vector<8x128xf32>
    %205 = arith.mulf %204, %203 : vector<8x128xf32>
    %cst_90 = arith.constant 5.000000e-01 : f32
    %206 = vector.broadcast %cst_90 : f32 to vector<8x128xf32>
    %207 = arith.addf %205, %206 : vector<8x128xf32>
    %208 = vector.extract_strided_slice %191 {offsets = [0, 256], sizes = [8, 128], strides = [1, 1]} : vector<8x512xf32> to vector<8x128xf32>
    %209 = math.tanh %208 : vector<8x128xf32>
    %210 = vector.extract_strided_slice %191 {offsets = [0, 384], sizes = [8, 128], strides = [1, 1]} : vector<8x512xf32> to vector<8x128xf32>
    %cst_91 = arith.constant 5.000000e-01 : f32
    %211 = vector.broadcast %cst_91 : f32 to vector<8x128xf32>
    %212 = arith.mulf %211, %210 : vector<8x128xf32>
    %213 = math.tanh %212 : vector<8x128xf32>
    %cst_92 = arith.constant 5.000000e-01 : f32
    %214 = vector.broadcast %cst_92 : f32 to vector<8x128xf32>
    %215 = arith.mulf %214, %213 : vector<8x128xf32>
    %cst_93 = arith.constant 5.000000e-01 : f32
    %216 = vector.broadcast %cst_93 : f32 to vector<8x128xf32>
    %217 = arith.addf %215, %216 : vector<8x128xf32>
    %218 = arith.mulf %207, %181 : vector<8x128xf32>
    %219 = arith.mulf %199, %209 : vector<8x128xf32>
    %220 = arith.addf %218, %219 : vector<8x128xf32>
    %221 = math.tanh %220 : vector<8x128xf32>
    %222 = arith.mulf %217, %221 : vector<8x128xf32>
    %c4_i32 = arith.constant 4 : i32
    %c8_i32_94 = arith.constant 8 : i32
    %223 = arith.muli %c4_i32, %c8_i32_94 : i32
    %224 = tpu.assume_multiple %223, 8 : i32
    %225 = arith.index_cast %224 : i32 to index
    %c0_95 = arith.constant 0 : index
    %226 = vector.load %arg7[%225, %c0_95] : memref<64x512xf32, #tpu.memory_space<vmem>>, vector<8x512xf32>
    %227 = arith.truncf %222 : vector<8x128xf32> to vector<8x128xbf16>
    %c0_96 = arith.constant 0 : index
    %c0_97 = arith.constant 0 : index
    %228 = vector.load %arg3[%c0_96, %c0_97] : memref<128x512xbf16, #tpu.memory_space<vmem>>, vector<128x512xbf16>
    %cst_98 = arith.constant dense<0.000000e+00> : vector<8x512xf32>
    %229 = tpu.matmul %227, %228, %cst_98 {dimension_numbers = #tpu.dot_dimension_numbers<[1], [0], [0], [1], [0, 0, 1, 1], [], []>} : vector<8x128xbf16>, vector<128x512xbf16>, vector<8x512xf32> -> vector<8x512xf32>
    %230 = arith.addf %226, %229 : vector<8x512xf32>
    %231 = vector.extract_strided_slice %230 {offsets = [0, 0], sizes = [8, 128], strides = [1, 1]} : vector<8x512xf32> to vector<8x128xf32>
    %cst_99 = arith.constant 5.000000e-01 : f32
    %232 = vector.broadcast %cst_99 : f32 to vector<8x128xf32>
    %233 = arith.mulf %232, %231 : vector<8x128xf32>
    %234 = math.tanh %233 : vector<8x128xf32>
    %cst_100 = arith.constant 5.000000e-01 : f32
    %235 = vector.broadcast %cst_100 : f32 to vector<8x128xf32>
    %236 = arith.mulf %235, %234 : vector<8x128xf32>
    %cst_101 = arith.constant 5.000000e-01 : f32
    %237 = vector.broadcast %cst_101 : f32 to vector<8x128xf32>
    %238 = arith.addf %236, %237 : vector<8x128xf32>
    %239 = vector.extract_strided_slice %230 {offsets = [0, 128], sizes = [8, 128], strides = [1, 1]} : vector<8x512xf32> to vector<8x128xf32>
    %cst_102 = arith.constant 5.000000e-01 : f32
    %240 = vector.broadcast %cst_102 : f32 to vector<8x128xf32>
    %241 = arith.mulf %240, %239 : vector<8x128xf32>
    %242 = math.tanh %241 : vector<8x128xf32>
    %cst_103 = arith.constant 5.000000e-01 : f32
    %243 = vector.broadcast %cst_103 : f32 to vector<8x128xf32>
    %244 = arith.mulf %243, %242 : vector<8x128xf32>
    %cst_104 = arith.constant 5.000000e-01 : f32
    %245 = vector.broadcast %cst_104 : f32 to vector<8x128xf32>
    %246 = arith.addf %244, %245 : vector<8x128xf32>
    %247 = vector.extract_strided_slice %230 {offsets = [0, 256], sizes = [8, 128], strides = [1, 1]} : vector<8x512xf32> to vector<8x128xf32>
    %248 = math.tanh %247 : vector<8x128xf32>
    %249 = vector.extract_strided_slice %230 {offsets = [0, 384], sizes = [8, 128], strides = [1, 1]} : vector<8x512xf32> to vector<8x128xf32>
    %cst_105 = arith.constant 5.000000e-01 : f32
    %250 = vector.broadcast %cst_105 : f32 to vector<8x128xf32>
    %251 = arith.mulf %250, %249 : vector<8x128xf32>
    %252 = math.tanh %251 : vector<8x128xf32>
    %cst_106 = arith.constant 5.000000e-01 : f32
    %253 = vector.broadcast %cst_106 : f32 to vector<8x128xf32>
    %254 = arith.mulf %253, %252 : vector<8x128xf32>
    %cst_107 = arith.constant 5.000000e-01 : f32
    %255 = vector.broadcast %cst_107 : f32 to vector<8x128xf32>
    %256 = arith.addf %254, %255 : vector<8x128xf32>
    %257 = arith.mulf %246, %220 : vector<8x128xf32>
    %258 = arith.mulf %238, %248 : vector<8x128xf32>
    %259 = arith.addf %257, %258 : vector<8x128xf32>
    %260 = math.tanh %259 : vector<8x128xf32>
    %261 = arith.mulf %256, %260 : vector<8x128xf32>
    %c5_i32 = arith.constant 5 : i32
    %c8_i32_108 = arith.constant 8 : i32
    %262 = arith.muli %c5_i32, %c8_i32_108 : i32
    %263 = tpu.assume_multiple %262, 8 : i32
    %264 = arith.index_cast %263 : i32 to index
    %c0_109 = arith.constant 0 : index
    %265 = vector.load %arg7[%264, %c0_109] : memref<64x512xf32, #tpu.memory_space<vmem>>, vector<8x512xf32>
    %266 = arith.truncf %261 : vector<8x128xf32> to vector<8x128xbf16>
    %c0_110 = arith.constant 0 : index
    %c0_111 = arith.constant 0 : index
    %267 = vector.load %arg3[%c0_110, %c0_111] : memref<128x512xbf16, #tpu.memory_space<vmem>>, vector<128x512xbf16>
    %cst_112 = arith.constant dense<0.000000e+00> : vector<8x512xf32>
    %268 = tpu.matmul %266, %267, %cst_112 {dimension_numbers = #tpu.dot_dimension_numbers<[1], [0], [0], [1], [0, 0, 1, 1], [], []>} : vector<8x128xbf16>, vector<128x512xbf16>, vector<8x512xf32> -> vector<8x512xf32>
    %269 = arith.addf %265, %268 : vector<8x512xf32>
    %270 = vector.extract_strided_slice %269 {offsets = [0, 0], sizes = [8, 128], strides = [1, 1]} : vector<8x512xf32> to vector<8x128xf32>
    %cst_113 = arith.constant 5.000000e-01 : f32
    %271 = vector.broadcast %cst_113 : f32 to vector<8x128xf32>
    %272 = arith.mulf %271, %270 : vector<8x128xf32>
    %273 = math.tanh %272 : vector<8x128xf32>
    %cst_114 = arith.constant 5.000000e-01 : f32
    %274 = vector.broadcast %cst_114 : f32 to vector<8x128xf32>
    %275 = arith.mulf %274, %273 : vector<8x128xf32>
    %cst_115 = arith.constant 5.000000e-01 : f32
    %276 = vector.broadcast %cst_115 : f32 to vector<8x128xf32>
    %277 = arith.addf %275, %276 : vector<8x128xf32>
    %278 = vector.extract_strided_slice %269 {offsets = [0, 128], sizes = [8, 128], strides = [1, 1]} : vector<8x512xf32> to vector<8x128xf32>
    %cst_116 = arith.constant 5.000000e-01 : f32
    %279 = vector.broadcast %cst_116 : f32 to vector<8x128xf32>
    %280 = arith.mulf %279, %278 : vector<8x128xf32>
    %281 = math.tanh %280 : vector<8x128xf32>
    %cst_117 = arith.constant 5.000000e-01 : f32
    %282 = vector.broadcast %cst_117 : f32 to vector<8x128xf32>
    %283 = arith.mulf %282, %281 : vector<8x128xf32>
    %cst_118 = arith.constant 5.000000e-01 : f32
    %284 = vector.broadcast %cst_118 : f32 to vector<8x128xf32>
    %285 = arith.addf %283, %284 : vector<8x128xf32>
    %286 = vector.extract_strided_slice %269 {offsets = [0, 256], sizes = [8, 128], strides = [1, 1]} : vector<8x512xf32> to vector<8x128xf32>
    %287 = math.tanh %286 : vector<8x128xf32>
    %288 = vector.extract_strided_slice %269 {offsets = [0, 384], sizes = [8, 128], strides = [1, 1]} : vector<8x512xf32> to vector<8x128xf32>
    %cst_119 = arith.constant 5.000000e-01 : f32
    %289 = vector.broadcast %cst_119 : f32 to vector<8x128xf32>
    %290 = arith.mulf %289, %288 : vector<8x128xf32>
    %291 = math.tanh %290 : vector<8x128xf32>
    %cst_120 = arith.constant 5.000000e-01 : f32
    %292 = vector.broadcast %cst_120 : f32 to vector<8x128xf32>
    %293 = arith.mulf %292, %291 : vector<8x128xf32>
    %cst_121 = arith.constant 5.000000e-01 : f32
    %294 = vector.broadcast %cst_121 : f32 to vector<8x128xf32>
    %295 = arith.addf %293, %294 : vector<8x128xf32>
    %296 = arith.mulf %285, %259 : vector<8x128xf32>
    %297 = arith.mulf %277, %287 : vector<8x128xf32>
    %298 = arith.addf %296, %297 : vector<8x128xf32>
    %299 = math.tanh %298 : vector<8x128xf32>
    %300 = arith.mulf %295, %299 : vector<8x128xf32>
    %c6_i32 = arith.constant 6 : i32
    %c8_i32_122 = arith.constant 8 : i32
    %301 = arith.muli %c6_i32, %c8_i32_122 : i32
    %302 = tpu.assume_multiple %301, 8 : i32
    %303 = arith.index_cast %302 : i32 to index
    %c0_123 = arith.constant 0 : index
    %304 = vector.load %arg7[%303, %c0_123] : memref<64x512xf32, #tpu.memory_space<vmem>>, vector<8x512xf32>
    %305 = arith.truncf %300 : vector<8x128xf32> to vector<8x128xbf16>
    %c0_124 = arith.constant 0 : index
    %c0_125 = arith.constant 0 : index
    %306 = vector.load %arg3[%c0_124, %c0_125] : memref<128x512xbf16, #tpu.memory_space<vmem>>, vector<128x512xbf16>
    %cst_126 = arith.constant dense<0.000000e+00> : vector<8x512xf32>
    %307 = tpu.matmul %305, %306, %cst_126 {dimension_numbers = #tpu.dot_dimension_numbers<[1], [0], [0], [1], [0, 0, 1, 1], [], []>} : vector<8x128xbf16>, vector<128x512xbf16>, vector<8x512xf32> -> vector<8x512xf32>
    %308 = arith.addf %304, %307 : vector<8x512xf32>
    %309 = vector.extract_strided_slice %308 {offsets = [0, 0], sizes = [8, 128], strides = [1, 1]} : vector<8x512xf32> to vector<8x128xf32>
    %cst_127 = arith.constant 5.000000e-01 : f32
    %310 = vector.broadcast %cst_127 : f32 to vector<8x128xf32>
    %311 = arith.mulf %310, %309 : vector<8x128xf32>
    %312 = math.tanh %311 : vector<8x128xf32>
    %cst_128 = arith.constant 5.000000e-01 : f32
    %313 = vector.broadcast %cst_128 : f32 to vector<8x128xf32>
    %314 = arith.mulf %313, %312 : vector<8x128xf32>
    %cst_129 = arith.constant 5.000000e-01 : f32
    %315 = vector.broadcast %cst_129 : f32 to vector<8x128xf32>
    %316 = arith.addf %314, %315 : vector<8x128xf32>
    %317 = vector.extract_strided_slice %308 {offsets = [0, 128], sizes = [8, 128], strides = [1, 1]} : vector<8x512xf32> to vector<8x128xf32>
    %cst_130 = arith.constant 5.000000e-01 : f32
    %318 = vector.broadcast %cst_130 : f32 to vector<8x128xf32>
    %319 = arith.mulf %318, %317 : vector<8x128xf32>
    %320 = math.tanh %319 : vector<8x128xf32>
    %cst_131 = arith.constant 5.000000e-01 : f32
    %321 = vector.broadcast %cst_131 : f32 to vector<8x128xf32>
    %322 = arith.mulf %321, %320 : vector<8x128xf32>
    %cst_132 = arith.constant 5.000000e-01 : f32
    %323 = vector.broadcast %cst_132 : f32 to vector<8x128xf32>
    %324 = arith.addf %322, %323 : vector<8x128xf32>
    %325 = vector.extract_strided_slice %308 {offsets = [0, 256], sizes = [8, 128], strides = [1, 1]} : vector<8x512xf32> to vector<8x128xf32>
    %326 = math.tanh %325 : vector<8x128xf32>
    %327 = vector.extract_strided_slice %308 {offsets = [0, 384], sizes = [8, 128], strides = [1, 1]} : vector<8x512xf32> to vector<8x128xf32>
    %cst_133 = arith.constant 5.000000e-01 : f32
    %328 = vector.broadcast %cst_133 : f32 to vector<8x128xf32>
    %329 = arith.mulf %328, %327 : vector<8x128xf32>
    %330 = math.tanh %329 : vector<8x128xf32>
    %cst_134 = arith.constant 5.000000e-01 : f32
    %331 = vector.broadcast %cst_134 : f32 to vector<8x128xf32>
    %332 = arith.mulf %331, %330 : vector<8x128xf32>
    %cst_135 = arith.constant 5.000000e-01 : f32
    %333 = vector.broadcast %cst_135 : f32 to vector<8x128xf32>
    %334 = arith.addf %332, %333 : vector<8x128xf32>
    %335 = arith.mulf %324, %298 : vector<8x128xf32>
    %336 = arith.mulf %316, %326 : vector<8x128xf32>
    %337 = arith.addf %335, %336 : vector<8x128xf32>
    %338 = math.tanh %337 : vector<8x128xf32>
    %339 = arith.mulf %334, %338 : vector<8x128xf32>
    %c7_i32 = arith.constant 7 : i32
    %c8_i32_136 = arith.constant 8 : i32
    %340 = arith.muli %c7_i32, %c8_i32_136 : i32
    %341 = tpu.assume_multiple %340, 8 : i32
    %342 = arith.index_cast %341 : i32 to index
    %c0_137 = arith.constant 0 : index
    %343 = vector.load %arg7[%342, %c0_137] : memref<64x512xf32, #tpu.memory_space<vmem>>, vector<8x512xf32>
    %344 = arith.truncf %339 : vector<8x128xf32> to vector<8x128xbf16>
    %c0_138 = arith.constant 0 : index
    %c0_139 = arith.constant 0 : index
    %345 = vector.load %arg3[%c0_138, %c0_139] : memref<128x512xbf16, #tpu.memory_space<vmem>>, vector<128x512xbf16>
    %cst_140 = arith.constant dense<0.000000e+00> : vector<8x512xf32>
    %346 = tpu.matmul %344, %345, %cst_140 {dimension_numbers = #tpu.dot_dimension_numbers<[1], [0], [0], [1], [0, 0, 1, 1], [], []>} : vector<8x128xbf16>, vector<128x512xbf16>, vector<8x512xf32> -> vector<8x512xf32>
    %347 = arith.addf %343, %346 : vector<8x512xf32>
    %348 = vector.extract_strided_slice %347 {offsets = [0, 0], sizes = [8, 128], strides = [1, 1]} : vector<8x512xf32> to vector<8x128xf32>
    %cst_141 = arith.constant 5.000000e-01 : f32
    %349 = vector.broadcast %cst_141 : f32 to vector<8x128xf32>
    %350 = arith.mulf %349, %348 : vector<8x128xf32>
    %351 = math.tanh %350 : vector<8x128xf32>
    %cst_142 = arith.constant 5.000000e-01 : f32
    %352 = vector.broadcast %cst_142 : f32 to vector<8x128xf32>
    %353 = arith.mulf %352, %351 : vector<8x128xf32>
    %cst_143 = arith.constant 5.000000e-01 : f32
    %354 = vector.broadcast %cst_143 : f32 to vector<8x128xf32>
    %355 = arith.addf %353, %354 : vector<8x128xf32>
    %356 = vector.extract_strided_slice %347 {offsets = [0, 128], sizes = [8, 128], strides = [1, 1]} : vector<8x512xf32> to vector<8x128xf32>
    %cst_144 = arith.constant 5.000000e-01 : f32
    %357 = vector.broadcast %cst_144 : f32 to vector<8x128xf32>
    %358 = arith.mulf %357, %356 : vector<8x128xf32>
    %359 = math.tanh %358 : vector<8x128xf32>
    %cst_145 = arith.constant 5.000000e-01 : f32
    %360 = vector.broadcast %cst_145 : f32 to vector<8x128xf32>
    %361 = arith.mulf %360, %359 : vector<8x128xf32>
    %cst_146 = arith.constant 5.000000e-01 : f32
    %362 = vector.broadcast %cst_146 : f32 to vector<8x128xf32>
    %363 = arith.addf %361, %362 : vector<8x128xf32>
    %364 = vector.extract_strided_slice %347 {offsets = [0, 256], sizes = [8, 128], strides = [1, 1]} : vector<8x512xf32> to vector<8x128xf32>
    %365 = math.tanh %364 : vector<8x128xf32>
    %366 = vector.extract_strided_slice %347 {offsets = [0, 384], sizes = [8, 128], strides = [1, 1]} : vector<8x512xf32> to vector<8x128xf32>
    %cst_147 = arith.constant 5.000000e-01 : f32
    %367 = vector.broadcast %cst_147 : f32 to vector<8x128xf32>
    %368 = arith.mulf %367, %366 : vector<8x128xf32>
    %369 = math.tanh %368 : vector<8x128xf32>
    %cst_148 = arith.constant 5.000000e-01 : f32
    %370 = vector.broadcast %cst_148 : f32 to vector<8x128xf32>
    %371 = arith.mulf %370, %369 : vector<8x128xf32>
    %cst_149 = arith.constant 5.000000e-01 : f32
    %372 = vector.broadcast %cst_149 : f32 to vector<8x128xf32>
    %373 = arith.addf %371, %372 : vector<8x128xf32>
    %374 = arith.mulf %363, %337 : vector<8x128xf32>
    %375 = arith.mulf %355, %365 : vector<8x128xf32>
    %376 = arith.addf %374, %375 : vector<8x128xf32>
    %377 = math.tanh %376 : vector<8x128xf32>
    %378 = arith.mulf %373, %377 : vector<8x128xf32>
    %c8_i32_150 = arith.constant 8 : i32
    %c0_151 = arith.constant 0 : index
    %c0_152 = arith.constant 0 : index
    %379 = vector.load %arg4[%c0_151, %c0_152] : memref<128x128xf32, #tpu.memory_space<vmem>>, vector<128x128xf32>
    %cst_153 = arith.constant dense<0.000000e+00> : vector<8x128xf32>
    %380 = tpu.matmul %378, %379, %cst_153 {dimension_numbers = #tpu.dot_dimension_numbers<[1], [0], [0], [1], [0, 0, 1, 1], [], []>} : vector<8x128xf32>, vector<128x128xf32>, vector<8x128xf32> -> vector<8x128xf32>
    %c0_154 = arith.constant 0 : index
    %c0_155 = arith.constant 0 : index
    %381 = vector.load %arg5[%c0_154, %c0_155] : memref<1x128xf32, #tpu.memory_space<vmem>>, vector<1x128xf32>
    %382 = vector.broadcast %381 : vector<1x128xf32> to vector<8x128xf32>
    %383 = arith.addf %380, %382 : vector<8x128xf32>
    %c0_156 = arith.constant 0 : index
    %c0_157 = arith.constant 0 : index
    %384 = vector.load %arg6[%c0_156, %c0_157] : memref<8x128xf32, #tpu.memory_space<vmem>>, vector<8x128xf32>
    tpu.vector_store %arg6[%c0_156, %c0_157], %383 {strides = array<i32>} : memref<8x128xf32, #tpu.memory_space<vmem>>, vector<8x128xf32>,
    return
  }
  func.func @transform_0(%arg0: i32, %arg1: memref<16xi32, #tpu.memory_space<smem>>) -> (i32, i32) {
    %c0_i32 = arith.constant 0 : i32
    %c0_i32_0 = arith.constant 0 : i32
    %c0_i32_1 = arith.constant 0 : i32
    return %c0_i32, %c0_i32_0 : i32, i32
  }
  func.func @transform_1(%arg0: i32, %arg1: memref<16xi32, #tpu.memory_space<smem>>) -> (i32, i32) {
    %c0_i32 = arith.constant 0 : i32
    %c0_i32_0 = arith.constant 0 : i32
    %c0_i32_1 = arith.constant 0 : i32
    return %c0_i32, %c0_i32_0 : i32, i32
  }
  func.func @transform_2(%arg0: i32, %arg1: memref<16xi32, #tpu.memory_space<smem>>) -> (i32, i32) {
    %c0_i32 = arith.constant 0 : i32
    %c0_i32_0 = arith.constant 0 : i32
    %c0_i32_1 = arith.constant 0 : i32
    return %c0_i32, %c0_i32_0 : i32, i32
  }
  func.func @transform_3(%arg0: i32, %arg1: memref<16xi32, #tpu.memory_space<smem>>) -> (i32, i32) {
    %c0_i32 = arith.constant 0 : i32
    %c0_i32_0 = arith.constant 0 : i32
    %c0_i32_1 = arith.constant 0 : i32
    return %c0_i32, %c0_i32_0 : i32, i32
  }
  func.func @transform_4(%arg0: i32, %arg1: memref<16xi32, #tpu.memory_space<smem>>) -> (i32, i32) {
    %c0_i32 = arith.constant 0 : i32
    %c0_i32_0 = arith.constant 0 : i32
    %c0_i32_1 = arith.constant 0 : i32
    return %c0_i32, %c0_i32_0 : i32, i32
  }
}

</mosaic_0001>

<bundles_post_ra>
// kernel: tpu_custom_call.1
= control target key start
LH: loop header
LB: loop body
LE: loop exit
PB: predicated region body
PF: predicated region fallthrough
CT: control target
= control target key end

     0   :  { %s2601_s0 = inlined_call_operand.hbm [shape: s32[16], index: 0, kind: input, shape index: {}]   ;;  %s2602_s1 = inlined_call_operand.hbm [shape: f32[24,512], index: 1, kind: input, shape index: {}]   ;;  %s2603_s2 = inlined_call_operand.hbm [shape: bf16[128,512], index: 2, kind: input, shape index: {}]   ;;  %s2604_s3 = inlined_call_operand.hbm [shape: f32[128,128], index: 3, kind: input, shape index: {}]   ;;  %s2605_s4 = inlined_call_operand.vmem [shape: f32[1,128], index: 4, kind: input, shape index: {}]   ;;  %s2606_s5 = inlined_call_operand.hbm [shape: f32[8,128], index: 5, kind: output, shape index: {}]  }
   0x1   :  { %s1907_s20 = scalar_lea.hbm %s2601_s0, 16 }
   0x2   :  { %p1908_p0 = scmp.ne.s32.totalorder %s2601_s0, %s1907_s20  ;;  %p1911_p1 = scmp.lt.u32.totalorder %s1907_s20, %s2601_s0 }
   0x4   :  { %p1913_p2 = pnand %p1911_p1, %p1908_p0 }
   0x6   :  { %1916 = shalt.err (!%p1913_p2)  }
   0x7   :  { %s2013_s25 = smov [#allocation4]  }
   0x8   :  { %11 = dma.hbm_to_smem %s2601_s0, 16, %s2013_s25, [#allocation3] }
   0x9   :  { %2005 = dma.done.wait [#allocation3], 16 }
   0xa   :  { %2006 = vsyncadd [#allocation3], 4294967280 }
   0xb   :  { %13 = sfence }
   0xc   :  { %14 = vsyncpa [#allocation6], 0 }
   0xd   :  { %15 = vsyncpa [#allocation9], 0 }
   0xe   :  { %16 = vsyncpa [#allocation7], 0  ;;  %s2014_s28 = smov [#allocation8]   ;;  %s1917_s7 = scalar_lea.hbm %s2603_s2, 4096 }
   0xf   :  { %s34_s29 = sshll.u32 %s2014_s28, 4  ;;  %p1918_p3 = scmp.ne.s32.totalorder %s2603_s2, %s1917_s7  ;;  %s35_s29 = int_to_ptr.vmem [resolvable:$true] %s34_s29 }
  0x10   :  { %p1921_p4 = scmp.lt.u32.totalorder %s1917_s7, %s2603_s2 }
  0x12   :  { %p1923_p5 = pnand %p1921_p4, %p1918_p3 }
  0x14   :  { %1926 = shalt.err (!%p1923_p5)
}
  0x15   :  { %s1927_s0 = scalar_lea.vmem %s35_s29, 4096  ;;  %p1932_p7 = scmp.lt.s32.totalorder %s35_s29, %s35_s29 }
  0x16   :  { %p1928_p6 = scmp.ne.s32.totalorder %s35_s29, %s1927_s0  ;;  %p1933_p8 = scmp.lt.s32.totalorder %s1927_s0, %s1927_s0 }
  0x18   :  { %p1934_p9 = por %p1933_p8, %p1932_p7 }
  0x1a   :  { %p1935_p10 = pnand %p1934_p9, %p1928_p6 }
  0x1c   :  { %1938 = shalt.err (!%p1935_p10)
}
  0x1d   :  { %s2015_s12 = smov 256   ;;  %s2016_s13 = smov 16  }
  0x1e   :  { %40 = dma.hbm_to_vmem [thread:$0]  %s2603_s2, 4096, %s35_s29, [#allocation9], %s2015_s12, %s2015_s12, %s2016_s13  }
  0x1f   :  { %s2017_s16 = smov [#allocation5]   ;;  %s1939_s20 = scalar_lea.hbm %s2602_s1, 1536 }
  0x20   :  { %s22_s17 = sshll.u32 %s2017_s16, 4  ;;  %p1940_p11 = scmp.ne.s32.totalorder %s2602_s1, %s1939_s20  ;;  %s23_s17 = int_to_ptr.vmem [resolvable:$true] %s22_s17 }
  0x21   :  { %p1943_p12 = scmp.lt.u32.totalorder %s1939_s20, %s2602_s1 }
  0x23   :  { %p1945_p13 = pnand %p1943_p12, %p1940_p11 }
  0x25   :  { %1948 = shalt.err (!%p1945_p13)
}
  0x26   :  { %s1949_s25 = scalar_lea.vmem %s23_s17, 1536  ;;  %p1954_p1 = scmp.lt.s32.totalorder %s23_s17, %s23_s17 }
  0x27   :  { %p1950_p0 = scmp.ne.s32.totalorder %s23_s17, %s1949_s25  ;;  %p1955_p2 = scmp.lt.s32.totalorder %s1949_s25, %s1949_s25 }
  0x29   :  { %p1956_p3 = por %p1955_p2, %p1954_p1 }
  0x2b   :  { %p1957_p4 = pnand %p1956_p3, %p1950_p0 }
  0x2d   :  { %1960 = shalt.err (!%p1957_p4)
}
  0x2e   :  { %s2018_s2 = smov 512   ;;  %s2019_s26 = smov 32  }
  0x2f   :  { %28 = dma.hbm_to_vmem [thread:$0]  %s2602_s1, 1536, %s23_s17, [#allocation6], %s2018_s2, %s2018_s2, %s2019_s26  }
  0x30   :  { %s2020_s29 = smov [#allocation10]   ;;  %s1961_s8 = scalar_lea.hbm %s2604_s3, 2048 }
  0x31   :  { %s46_s30 = sshll.u32 %s2020_s29, 4  ;;  %p1962_p5 = scmp.ne.s32.totalorder %s2604_s3, %s1961_s8  ;;  %s47_s30 = int_to_ptr.vmem [resolvable:$true] %s46_s30 }
  0x32   :  { %p1965_p6 = scmp.lt.u32.totalorder %s1961_s8, %s2604_s3 }
  0x34   :  { %p1967_p7 = pnand %p1965_p6, %p1962_p5 }
  0x36   :  { %1970 = shalt.err (!%p1967_p7)
}
  0x37   :  { %s1971_s12 = scalar_lea.vmem %s47_s30, 2048  ;;  %p1976_p9 = scmp.lt.s32.totalorder %s47_s30, %s47_s30 }
  0x38   :  { %p1972_p8 = scmp.ne.s32.totalorder %s47_s30, %s1971_s12  ;;  %p1977_p10 = scmp.lt.s32.totalorder %s1971_s12, %s1971_s12 }
  0x3a   :  { %p1978_p11 = por %p1977_p10, %p1976_p9 }
  0x3c   :  { %p1979_p12 = pnand %p1978_p11, %p1972_p8 }
  0x3e   :  { %1982 = shalt.err (!%p1979_p12)
}
  0x3f   :  { %s2021_s1 = smov 128   ;;  %s2022_s13 = smov 8  }
  0x40   :  { %52 = dma.hbm_to_vmem [thread:$0]  %s2604_s3, 2048, %s47_s30, [#allocation9], %s2021_s1, %s2021_s1, %s2022_s13  }
  0x41   :  { %2007 = dma.done.wait [#allocation6], 1536  }
  0x42   :  { %2008 = vsyncadd [#allocation6], 4294965760 }
  0x43   :  { %2009 = dma.done.wait [#allocation9], 6144  }
  0x44   :  { %2010 = vsyncadd [#allocation9], 4294961152  ;;  %v2023_v0 = vmov 0   ;;  %v2024_v1 = vmov 0.0   ;;  %v2140_v2 = vld [vmem:[#allocation8 + $0x4] ss:$16 sps:$4 sm:$0xff]   ;;  %v107_v21 = vlaneseq }
  0x45   :  { %539 = vmatprep.mubr.bf16.mxu0 %v2023_v0  ;;  %580 = vmatprep.mubr.bf16.mxu1 %v2023_v0  ;;  %65 = vst [vmem:[#allocation2] sm:$0xff] %v2024_v1  ;;  %66 = vst [vmem:[#allocation2 + $0x8] sm:$0xff] %v2024_v1  ;;  %v2142_v3 = vld [vmem:[#allocation8] ss:$16 sps:$4 sm:$0xff]   ;;  %s2144_s3 = sld [smem:[#allocation4]]  ;;  %s1565_s26 = sld [smem:[#allocation4 + $0x1]] }
  0x46   :  { %67 = vst [vmem:[#allocation2 + $0x10] sm:$0xff] %v2024_v1  ;;  %68 = vst [vmem:[#allocation2 + $0x18] sm:$0xff] %v2024_v1  ;;  %507 = vmatprep.subr.bf16.mxu0 %v2140_v2  ;;  %v2147_v4 = vld [vmem:[#allocation8 + $0x24] ss:$16 sps:$4 sm:$0xff]   ;;  %s2149_s16 = sld [smem:[#allocation4 + $0x8]]  ;;  %vm2213_vm0 = vcmp.lt.s32.totalorder %v107_v21, 512 }
  0x47   :  { %69 = vst [vmem:[#allocation2 + $0x20] sm:$0xff] %v2024_v1  ;;  %70 = vst [vmem:[#allocation2 + $0x28] sm:$0xff] %v2024_v1  ;;  %508 = vmatpush1.bf16.msra.mxu0 %v2142_v3  ;;  %v2152_v5 = vld [vmem:[#allocation8 + $0xc] ss:$16 sps:$4 sm:$0xff]   ;;  %v2154_v6 = vld [vmem:[#allocation8 + $0x20] ss:$16 sps:$4 sm:$0xff]  }
  0x48   :  { %71 = vst [vmem:[#allocation2 + $0x30] sm:$0xff] %v2024_v1  ;;  %72 = vst [vmem:[#allocation2 + $0x38] sm:$0xff] %v2024_v1  ;;  %v2156_v7 = vld [vmem:[#allocation8 + $0x8] ss:$16 sps:$4 sm:$0xff]   ;;  %509 = vmatprep.subr.bf16.mxu0 %v2147_v4  ;;  %v2159_v8 = vld [vmem:[#allocation8 + $0x44] ss:$16 sps:$4 sm:$0xff]   ;;  %548 = vmatprep.subr.bf16.mxu1 %v2152_v5 }
  0x49   :  { %73 = vst [vmem:[#allocation2 + $0x40] sm:$0xff] %v2024_v1  ;;  %74 = vst [vmem:[#allocation2 + $0x48] sm:$0xff] %v2024_v1  ;;  %v2162_v9 = vld [vmem:[#allocation8 + $0x2c] ss:$16 sps:$4 sm:$0xff]   ;;  %549 = vmatpush1.bf16.msra.mxu1 %v2156_v7  ;;  %v2165_v10 = vld [vmem:[#allocation8 + $0x28] ss:$16 sps:$4 sm:$0xff]  }
  0x4a   :  { %75 = vst [vmem:[#allocation2 + $0x50] sm:$0xff] %v2024_v1  ;;  %76 = vst [vmem:[#allocation2 + $0x58] sm:$0xff] %v2024_v1  ;;  %550 = vmatprep.subr.bf16.mxu1 %v2162_v9  ;;  %v2169_v11 = vld [vmem:[#allocation8 + $0x40] ss:$16 sps:$4 sm:$0xff]   ;;  %v2172_v12 = vld [vmem:[#allocation8 + $0x64] ss:$16 sps:$4 sm:$0xff]  }
  0x4b   :  { %77 = vst [vmem:[#allocation2 + $0x60] sm:$0xff] %v2024_v1  ;;  %78 = vst [vmem:[#allocation2 + $0x68] sm:$0xff] %v2024_v1  ;;  %510 = vmatpush1.bf16.msra.mxu0 %v2154_v6  ;;  %v2174_v13 = vld [vmem:[#allocation8 + $0x4c] ss:$16 sps:$4 sm:$0xff]   ;;  %s98_s17 = sshra.s32 %s2144_s3, 3  ;;  %s101_s19 = sand.u32 7, %s2144_s3 }
  0x4c   :  { %79 = vst [vmem:[#allocation2 + $0x70] sm:$0xff] %v2024_v1  ;;  %80 = vst [vmem:[#allocation2 + $0x78] sm:$0xff] %v2024_v1  ;;  %511 = vmatprep.subr.bf16.mxu0 %v2159_v8  ;;  %v2178_v14 = vld [vmem:[#allocation8 + $0x48] ss:$16 sps:$4 sm:$0xff]   ;;  %s114_s18 = sshra.s32 %s2149_s16, 3  ;;  %s1640_s20 = sshll.u32 %s98_s17, 5 }
  0x4d   :  { %81 = vst [vmem:[#allocation2 + $0x80] sm:$0xff] %v2024_v1  ;;  %82 = vst [vmem:[#allocation2 + $0x88] sm:$0xff] %v2024_v1  ;;  %551 = vmatpush1.bf16.msra.mxu1 %v2165_v10  ;;  %v2183_v15 = vld [vmem:[#allocation8 + $0x60] ss:$16 sps:$4 sm:$0xff]   ;;  %v2185_v16 = vld [vmem:[#allocation8 + $0x6c] ss:$16 sps:$4 sm:$0xff]   ;;  %s104_s23 = sadd.s32 %s1640_s20, %s101_s19 }
  0x4e   :  { %83 = vst [vmem:[#allocation2 + $0x90] sm:$0xff] %v2024_v1  ;;  %84 = vst [vmem:[#allocation2 + $0x98] sm:$0xff] %v2024_v1  ;;  %552 = vmatprep.subr.bf16.mxu1 %v2174_v13  ;;  %v2188_v17 = vld [vmem:[#allocation8 + $0x84] ss:$16 sps:$4 sm:$0xff]   ;;  %s117_s21 = sand.u32 7, %s2149_s16  ;;  %s1641_s22 = sshll.u32 %s114_s18, 5 }
  0x4f   :  { %85 = vst [vmem:[#allocation2 + $0xa0] sm:$0xff] %v2024_v1  ;;  %86 = vst [vmem:[#allocation2 + $0xa8] sm:$0xff] %v2024_v1  ;;  %512 = vmatpush1.bf16.msra.mxu0 %v2169_v11  ;;  %v2193_v18 = vld [vmem:[#allocation8 + $0x80] ss:$16 sps:$4 sm:$0xff]   ;;  %v2195_v19 = vld [vmem:[#allocation8 + $0x68] ss:$16 sps:$4 sm:$0xff]   ;;  %s120_s24 = sadd.s32 %s1641_s22, %s117_s21 }
  0x50   :  { %87 = vst [vmem:[#allocation2 + $0xb0] sm:$0xff] %v2024_v1  ;;  %88 = vst [vmem:[#allocation2 + $0xb8] sm:$0xff] %v2024_v1  ;;  %513 = vmatprep.subr.bf16.mxu0 %v2172_v12  ;;  %v2199_v20 = vld [vmem:[#allocation8 + $0x8c] ss:$16 sps:$4 sm:$0xff]   ;;  %v2202_v22 = vld [vmem:[#allocation8 + $0xa4] ss:$16 sps:$4 sm:$0xff]  }
  0x51   :  { %89 = vst [vmem:[#allocation2 + $0xc0] sm:$0xff] %v2024_v1  ;;  %90 = vst [vmem:[#allocation2 + $0xc8] sm:$0xff] %v2024_v1  ;;  %553 = vmatpush1.bf16.msra.mxu1 %v2178_v14  ;;  %v2205_v23 = vld [vmem:[#allocation8 + $0x88] ss:$16 sps:$4 sm:$0xff]   ;;  %v2209_v24 = vld [vmem:[#allocation8 + $0xa0] ss:$16 sps:$4 sm:$0xff]  }
  0x52   :  { %91 = vst [vmem:[#allocation2 + $0xd0] sm:$0xff] %v2024_v1  ;;  %92 = vst [vmem:[#allocation2 + $0xd8] sm:$0xff] %v2024_v1  ;;  %554 = vmatprep.subr.bf16.mxu1 %v2185_v16  ;;  %v2211_v25 = vld [vmem:[#allocation8 + $0xac] ss:$16 sps:$4 sm:$0xff]   ;;  %v2218_v27 = vld [vmem:[#allocation8 + $0xc4] ss:$16 sps:$4 sm:$0xff]  }
  0x53   :  { %93 = vst [vmem:[#allocation2 + $0xe0] sm:$0xff] %v2024_v1  ;;  %94 = vst [vmem:[#allocation2 + $0xe8] sm:$0xff] %v2024_v1  ;;  %514 = vmatpush1.bf16.msra.mxu0 %v2183_v15  ;;  %s105_s25 = scalar_lea.vmem [#allocation5], %s104_s23  ;;  %v2221_v29 = vld [vmem:[#allocation8 + $0xa8] ss:$16 sps:$4 sm:$0xff]   ;;  %s121_s2 = scalar_lea.vmem [#allocation5], %s120_s24 }
  0x54   :  { %95 = vst [vmem:[#allocation2 + $0xf0] sm:$0xff] %v2024_v1  ;;  %96 = vst [vmem:[#allocation2 + $0xf8] sm:$0xff] %v2024_v1  ;;  %515 = vmatprep.subr.bf16.mxu0 %v2188_v17  ;;  %v106_v28 = vld [vmem:[%s105_s25] ss:$8 sm:$0xf]  ;;  %s1568_s27 = sld [smem:[#allocation4 + $0x9]] }
  0x55   :  { %555 = vmatpush1.bf16.msra.mxu1 %v2195_v19  ;;  %111 = vst.msk [vmem:[#allocation2] ss:$8 sm:$0xf] %vm2213_vm0, %v106_v28  ;;  %v122_v30 = vld [vmem:[%s121_s2] ss:$8 sm:$0xf] }
  0x56   :  { %556 = vmatprep.subr.bf16.mxu1 %v2199_v20  ;;  %v2227_v31 = vld [vmem:[#allocation8 + $0xc0] ss:$16 sps:$4 sm:$0xff]   ;;  %v2229_v32 = vld [vmem:[#allocation8 + $0xcc] ss:$16 sps:$4 sm:$0xff]   ;;  %v2234_v33 = vld [vmem:[#allocation8 + $0xe4] ss:$16 sps:$4 sm:$0xff]  }
  0x57   :  { %516 = vmatpush1.bf16.msra.mxu0 %v2193_v18  ;;  %124 = vst.msk [vmem:[#allocation2 + $0x1] ss:$8 sm:$0xf] %vm2213_vm0, %v122_v30  ;;  %v2237_v34 = vld [vmem:[#allocation8 + $0xc8] ss:$16 sps:$4 sm:$0xff]   ;;  %s127_s28 = sshra.s32 %s1565_s26, 3 }
  0x58   :  { %517 = vmatprep.subr.bf16.mxu0 %v2202_v22  ;;  %v2241_v35 = vld [vmem:[#allocation8 + $0xe0] ss:$16 sps:$4 sm:$0xff]   ;;  %v2243_v36 = vld [vmem:[#allocation8 + $0xec] ss:$16 sps:$4 sm:$0xff]   ;;  %v2247_v37 = vld [vmem:[#allocation8 + $0xe8] ss:$16 sps:$4 sm:$0xff]  }
  0x59   :  { %557 = vmatpush1.bf16.msra.mxu1 %v2205_v23  ;;  %s130_s29 = sand.u32 7, %s1565_s26  ;;  %s1642_s30 = sshll.u32 %s127_s28, 5  ;;  %vm2026_vm1 = vmmov 0  }
  0x5a   :  { %558 = vmatprep.subr.bf16.mxu1 %v2211_v25  ;;  %s140_s6 = sshra.s32 %s1568_s27, 3  ;;  %s133_s7 = sadd.s32 %s1642_s30, %s130_s29 }
  0x5b   :  { %518 = vmatpush1.bf16.msra.mxu0 %v2209_v24  ;;  %s143_s8 = sand.u32 7, %s1568_s27  ;;  %s1643_s9 = sshll.u32 %s140_s6, 5 }
  0x5c   :  { %519 = vmatprep.subr.bf16.mxu0 %v2218_v27  ;;  %s134_s10 = scalar_lea.vmem [#allocation5], %s133_s7  ;;  %s146_s11 = sadd.s32 %s1643_s9, %s143_s8 }
  0x5d   :  { %559 = vmatpush1.bf16.msra.mxu1 %v2221_v29  ;;  %v135_v38 = vld [vmem:[%s134_s10] ss:$8 sm:$0xf]  ;;  %s147_s0 = scalar_lea.vmem [#allocation5], %s146_s11  ;;  %s1571_s12 = sld [smem:[#allocation4 + $0x2]] }
  0x5e   :  { %560 = vmatprep.subr.bf16.mxu1 %v2229_v32  ;;  %137 = vst.msk [vmem:[#allocation2 + $0x20] ss:$8 sm:$0xf] %vm2213_vm0, %v135_v38  ;;  %v148_v39 = vld [vmem:[%s147_s0] ss:$8 sm:$0xf] }
  0x5f   :  { %520 = vmatpush1.bf16.msra.mxu0 %v2227_v31  ;;  %150 = vst.msk [vmem:[#allocation2 + $0x21] ss:$8 sm:$0xf] %vm2213_vm0, %v148_v39  ;;  %v311_v40 = vld [vmem:[#allocation2] sm:$0xff]  ;;  %v312_v41 = vld [vmem:[#allocation2 + $0x8] sm:$0xff]  ;;  %v313_v45 = vld [vmem:[#allocation2 + $0x10] sm:$0xff] }
  0x60   :  { %521 = vmatprep.subr.bf16.mxu0 %v2234_v33  ;;  %v314_v55 = vld [vmem:[#allocation2 + $0x18] sm:$0xff]  ;;  %s1574_s1 = sld [smem:[#allocation4 + $0xa]]  ;;  %s1577_s22 = sld [smem:[#allocation4 + $0x3]] }
  0x61   :  { %561 = vmatpush1.bf16.msra.mxu1 %v2237_v34  ;;  %s1580_s23 = sld [smem:[#allocation4 + $0xb]]  ;;  %s1583_s8 = sld [smem:[#allocation4 + $0x4]] }
  0x62   :  { %562 = vmatprep.subr.bf16.mxu1 %v2243_v36  ;;  %s1586_s9 = sld [smem:[#allocation4 + $0xc]] }
  0x63   :  { %522 = vmatpush1.bf16.msra.mxu0 %v2241_v35  ;;  %s153_s13 = sshra.s32 %s1571_s12, 3  ;;  %s156_s14 = sand.u32 7, %s1571_s12 }
  0x64   :  { %619 = vmatprep.subr.bf16.mxu0 %v2140_v2  ;;  %s1644_s15 = sshll.u32 %s153_s13, 5 }
  0x65   :  { %563 = vmatpush1.bf16.msra.mxu1 %v2247_v37  ;;  %s159_s16 = sadd.s32 %s1644_s15, %s156_s14 }
  0x66   :  { %540 = vmatmul.mubr.bf16.vlgmr.msra.gmra.mrb[0].mxu0 %v2023_v0  ;;  %660 = vmatprep.subr.bf16.mxu1 %v2152_v5  ;;  %s166_s3 = sshra.s32 %s1574_s1, 3  ;;  %s169_s17 = sand.u32 7, %s1574_s1 }
  0x67   :  { %620 = vmatpush1.bf16.msra.mxu0 %v2142_v3  ;;  %651 = vmatprep.mubr.bf16.mxu0 %v2023_v0  ;;  %s1645_s18 = sshll.u32 %s166_s3, 5  ;;  %s160_s19 = scalar_lea.vmem [#allocation5], %s159_s16 }
  0x68   :  { %621 = vmatprep.subr.bf16.mxu0 %v2147_v4  ;;  %581 = vmatmul.mubr.bf16.vlgmr.msra.gmra.mrb[0].mxu1 %v2023_v0  ;;  %s172_s20 = sadd.s32 %s1645_s18, %s169_s17  ;;  %s179_s24 = sshra.s32 %s1577_s22, 3 }
  0x69   :  { %661 = vmatpush1.bf16.msra.mxu1 %v2156_v7  ;;  %692 = vmatprep.mubr.bf16.mxu1 %v2023_v0  ;;  %s173_s21 = scalar_lea.vmem [#allocation5], %s172_s20  ;;  %s182_s25 = sand.u32 7, %s1577_s22 }
  0x6a   :  { %662 = vmatprep.subr.bf16.mxu1 %v2162_v9  ;;  %s1646_s2 = sshll.u32 %s179_s24, 5  ;;  %s192_s26 = sshra.s32 %s1580_s23, 3 }
  0x6b   :  { %622 = vmatpush1.bf16.msra.mxu0 %v2154_v6  ;;  %s185_s27 = sadd.s32 %s1646_s2, %s182_s25  ;;  %s195_s28 = sand.u32 7, %s1580_s23 }
  0x6c   :  { %623 = vmatprep.subr.bf16.mxu0 %v2159_v8  ;;  %s1647_s29 = sshll.u32 %s192_s26, 5  ;;  %s186_s30 = scalar_lea.vmem [#allocation5], %s185_s27 }
  0x6d   :  { %663 = vmatpush1.bf16.msra.mxu1 %v2165_v10  ;;  %s198_s6 = sadd.s32 %s1647_s29, %s195_s28  ;;  %s205_s10 = sshra.s32 %s1583_s8, 3 }
  0x6e   :  { %664 = vmatprep.subr.bf16.mxu1 %v2174_v13  ;;  %s199_s7 = scalar_lea.vmem [#allocation5], %s198_s6  ;;  %s208_s11 = sand.u32 7, %s1583_s8 }
  0x6f   :  { %624 = vmatpush1.bf16.msra.mxu0 %v2169_v11  ;;  %s1648_s0 = sshll.u32 %s205_s10, 5  ;;  %s218_s12 = sshra.s32 %s1586_s9, 3 }
  0x70   :  { %625 = vmatprep.subr.bf16.mxu0 %v2172_v12  ;;  %s211_s1 = sadd.s32 %s1648_s0, %s208_s11  ;;  %s221_s13 = sand.u32 7, %s1586_s9 }
  0x71   :  { %665 = vmatpush1.bf16.msra.mxu1 %v2178_v14  ;;  %s1649_s14 = sshll.u32 %s218_s12, 5  ;;  %s212_s15 = scalar_lea.vmem [#allocation5], %s211_s1 }
  0x72   :  { %666 = vmatprep.subr.bf16.mxu1 %v2185_v16  ;;  %s224_s3 = sadd.s32 %s1649_s14, %s221_s13  ;;  %s1589_s17 = sld [smem:[#allocation4 + $0x5]] }
  0x73   :  { %626 = vmatpush1.bf16.msra.mxu0 %v2183_v15  ;;  %s225_s16 = scalar_lea.vmem [#allocation5], %s224_s3  ;;  %s1592_s18 = sld [smem:[#allocation4 + $0xd]] }
  0x74   :  { %627 = vmatprep.subr.bf16.mxu0 %v2188_v17  ;;  %s1595_s28 = sld [smem:[#allocation4 + $0x6]]  ;;  %s1601_s13 = sld [smem:[#allocation4 + $0x7]] }
  0x75   :  { %667 = vmatpush1.bf16.msra.mxu1 %v2195_v19  ;;  %s1598_s29 = sld [smem:[#allocation4 + $0xe]]  ;;  %s1604_s14 = sld [smem:[#allocation4 + $0xf]] }
  0x76   :  { %668 = vmatprep.subr.bf16.mxu1 %v2199_v20 }
  0x77   :  { %628 = vmatpush1.bf16.msra.mxu0 %v2193_v18 }
  0x78   :  { %629 = vmatprep.subr.bf16.mxu0 %v2202_v22  ;;  %s234_s20 = sand.u32 7, %s1589_s17 }
  0x79   :  { %669 = vmatpush1.bf16.msra.mxu1 %v2205_v23  ;;  %s244_s22 = sshra.s32 %s1592_s18, 3  ;;  %s247_s24 = sand.u32 7, %s1592_s18 }
  0x7a   :  { %670 = vmatprep.subr.bf16.mxu1 %v2211_v25  ;;  %s1651_s25 = sshll.u32 %s244_s22, 5  ;;  %s260_s6 = sand.u32 7, %s1595_s28 }
  0x7b   :  { %630 = vmatpush1.bf16.msra.mxu0 %v2209_v24  ;;  %s250_s26 = sadd.s32 %s1651_s25, %s247_s24  ;;  %s270_s8 = sshra.s32 %s1598_s29, 3 }
  0x7c   :  { %631 = vmatprep.subr.bf16.mxu0 %v2218_v27  ;;  %s251_s27 = scalar_lea.vmem [#allocation5], %s250_s26  ;;  %s273_s10 = sand.u32 7, %s1598_s29 }
  0x7d   :  { %671 = vmatpush1.bf16.msra.mxu1 %v2221_v29  ;;  %s1653_s11 = sshll.u32 %s270_s8, 5  ;;  %s286_s3 = sand.u32 7, %s1601_s13 }
  0x7e   :  { %672 = vmatprep.subr.bf16.mxu1 %v2229_v32  ;;  %s276_s12 = sadd.s32 %s1653_s11, %s273_s10 }
  0x7f   :  { %632 = vmatpush1.bf16.msra.mxu0 %v2227_v31  ;;  %s277_s1 = scalar_lea.vmem [#allocation5], %s276_s12 }
  0x80   :  { %633 = vmatprep.subr.bf16.mxu0 %v2234_v33 }
  0x81   :  { %673 = vmatpush1.bf16.msra.mxu1 %v2237_v34 }
  0x82   :  { %674 = vmatprep.subr.bf16.mxu1 %v2243_v36 }
  0x83   :  { %634 = vmatpush1.bf16.msra.mxu0 %v2241_v35 }
  0x84   :  { %731 = vmatprep.subr.bf16.mxu0 %v2140_v2 }
  0x85   :  { %675 = vmatpush1.bf16.msra.mxu1 %v2247_v37 }
  0x86   :  { %772 = vmatprep.subr.bf16.mxu1 %v2152_v5 }
 0x139   :  { %v541_v42 = vpop.f32.mrb[0].mxu0 }
 0x13a   :  { %v589_v43 = vadd.f32 %v541_v42, %v311_v40  ;;  %v543_v44 = vpop.f32.mrb[1].mxu0 }
 0x13b   :  { %v590_v46 = vadd.f32 %v543_v44, %v312_v41  ;;  %v545_v47 = vpop.f32.mrb[2].mxu0  ;;  %v582_v50 = vpop.f32.mrb[0].mxu1 }
 0x13c   :  { %v593_v48 = vmul.f32 0.5, %v589_v43  ;;  %v546_v49 = vpop.f32.mrb[3].mxu0  ;;  %v591_v52 = vadd.f32 %v582_v50, %v313_v45  ;;  %v584_v53 = vpop.f32.mrb[1].mxu1  ;;  %v174_v47 = vld [vmem:[%s173_s21] ss:$8 sm:$0xf] }
 0x13d   :  { %v597_v51 = vmul.f32 0.5, %v590_v46  ;;  %v586_v54 = vpop.f32.mrb[2].mxu1  ;;  %v592_v57 = vadd.f32 %v584_v53, %v314_v55  ;;  %v161_v46 = vld [vmem:[%s160_s19] ss:$8 sm:$0xf]  ;;  %s231_s19 = sshra.s32 %s1589_s17, 3 }
 0x13e   :  { %1795 = vtanh.f32 %v593_v48  ;;  %v587_v56 = vpop.f32.mrb[3].mxu1  ;;  %163 = vst.msk [vmem:[#allocation2 + $0x40] ss:$8 sm:$0xf] %vm2213_vm0, %v161_v46  ;;  %v614_v48 = vld [vmem:[#allocation2 + $0x20] sm:$0xff]  ;;  %v615_v49 = vld [vmem:[#allocation2 + $0x28] sm:$0xff] }
 0x13f   :  { %1797 = vtanh.f32 %v597_v51  ;;  %v602_v58 = vmul.f32 0.5, %v592_v57  ;;  %176 = vst.msk [vmem:[#allocation2 + $0x41] ss:$8 sm:$0xf] %vm2213_vm0, %v174_v47  ;;  %v616_v55 = vld [vmem:[#allocation2 + $0x30] sm:$0xff]  ;;  %s1650_s21 = sshll.u32 %s231_s19, 5 }
 0x140   :  { %1799 = vtanh.f32 %v591_v52  ;;  %s237_s23 = sadd.s32 %s1650_s21, %s234_s20  ;;  %s296_s17 = sshra.s32 %s1604_s14, 3 }
 0x141   :  { %1801 = vtanh.f32 %v602_v58  ;;  %s238_s2 = scalar_lea.vmem [#allocation5], %s237_s23  ;;  %s299_s19 = sand.u32 7, %s1604_s14 }
 0x142   :  { %s1655_s20 = sshll.u32 %s296_s17, 5 }
 0x143   :  { %s302_s22 = sadd.s32 %s1655_s20, %s299_s19 }
 0x144   :  { %s303_s23 = scalar_lea.vmem [#allocation5], %s302_s22 }
 0x148   :  { %v1796_v59 = vpop.eup %1795 }
 0x149   :  { %v1798_v60 = vpop.eup %1797  ;;  %v595_v61 = vmul.f32 0.5, %v1796_v59 }
 0x14a   :  { %v1800_v62 = vpop.eup %1799  ;;  %v599_v63 = vmul.f32 0.5, %v1798_v60 }
 0x14b   :  { %v596_v21 = vadd.f32 0.5, %v595_v61  ;;  %v1802_v40 = vpop.eup %1801 }
 0x14c   :  { %v600_v28 = vadd.f32 0.5, %v599_v63  ;;  %v604_v41 = vmul.f32 0.5, %v1802_v40 }
 0x14d   :  { %v607_v30 = vmul.f32 %v1800_v62, %v596_v21  ;;  %v617_v21 = vld [vmem:[#allocation2 + $0x38] sm:$0xff] }
 0x14e   :  { %v606_v38 = vmul.f32 0.0, %v600_v28  ;;  %v605_v42 = vadd.f32 0.5, %v604_v41 }
 0x150   :  { %v2294_v39 = vadd.f32 %v607_v30, %v606_v38 }
 0x152   :  { %1803 = vtanh.f32 %v2294_v39 }
 0x15c   :  { %v1804_v43 = vpop.eup %1803 }
 0x15d   :  { %v610_v44 = vmul.f32 %v1804_v43, %v605_v42 }
 0x15f   :  { %v618_v45 = vpack.c.bf16 %v610_v44, %v610_v44 }
 0x161   :  { %652 = vmatmul.mubr.bf16.vlgmr.msra.gmra.mrb[4].mxu0 %v618_v45  ;;  %693 = vmatmul.mubr.bf16.vlgmr.msra.gmra.mrb[4].mxu1 %v618_v45 }
 0x162   :  { %732 = vmatpush1.bf16.msra.mxu0 %v2142_v3  ;;  %773 = vmatpush1.bf16.msra.mxu1 %v2156_v7 }
 0x163   :  { %733 = vmatprep.subr.bf16.mxu0 %v2147_v4  ;;  %774 = vmatprep.subr.bf16.mxu1 %v2162_v9 }
 0x164   :  { %763 = vmatprep.mubr.bf16.mxu0 %v2023_v0  ;;  %804 = vmatprep.mubr.bf16.mxu1 %v2023_v0 }
 0x166   :  { %734 = vmatpush1.bf16.msra.mxu0 %v2154_v6  ;;  %775 = vmatpush1.bf16.msra.mxu1 %v2165_v10 }
 0x167   :  { %735 = vmatprep.subr.bf16.mxu0 %v2159_v8  ;;  %776 = vmatprep.subr.bf16.mxu1 %v2174_v13 }
 0x16a   :  { %736 = vmatpush1.bf16.msra.mxu0 %v2169_v11  ;;  %777 = vmatpush1.bf16.msra.mxu1 %v2178_v14 }
 0x16b   :  { %737 = vmatprep.subr.bf16.mxu0 %v2172_v12  ;;  %778 = vmatprep.subr.bf16.mxu1 %v2185_v16 }
 0x16e   :  { %738 = vmatpush1.bf16.msra.mxu0 %v2183_v15  ;;  %779 = vmatpush1.bf16.msra.mxu1 %v2195_v19 }
 0x16f   :  { %739 = vmatprep.subr.bf16.mxu0 %v2188_v17  ;;  %780 = vmatprep.subr.bf16.mxu1 %v2199_v20 }
 0x172   :  { %740 = vmatpush1.bf16.msra.mxu0 %v2193_v18  ;;  %781 = vmatpush1.bf16.msra.mxu1 %v2205_v23 }
 0x173   :  { %741 = vmatprep.subr.bf16.mxu0 %v2202_v22  ;;  %782 = vmatprep.subr.bf16.mxu1 %v2211_v25 }
 0x176   :  { %742 = vmatpush1.bf16.msra.mxu0 %v2209_v24  ;;  %783 = vmatpush1.bf16.msra.mxu1 %v2221_v29 }
 0x177   :  { %743 = vmatprep.subr.bf16.mxu0 %v2218_v27  ;;  %784 = vmatprep.subr.bf16.mxu1 %v2229_v32 }
 0x17a   :  { %744 = vmatpush1.bf16.msra.mxu0 %v2227_v31  ;;  %785 = vmatpush1.bf16.msra.mxu1 %v2237_v34 }
 0x17b   :  { %745 = vmatprep.subr.bf16.mxu0 %v2234_v33  ;;  %786 = vmatprep.subr.bf16.mxu1 %v2243_v36 }
 0x17e   :  { %746 = vmatpush1.bf16.msra.mxu0 %v2241_v35  ;;  %787 = vmatpush1.bf16.msra.mxu1 %v2247_v37 }
 0x17f   :  { %843 = vmatprep.subr.bf16.mxu0 %v2140_v2  ;;  %884 = vmatprep.subr.bf16.mxu1 %v2152_v5 }
 0x234   :  { %v653_v50 = vpop.f32.mrb[4].mxu0  ;;  %v694_v51 = vpop.f32.mrb[4].mxu1 }
 0x235   :  { %v701_v52 = vadd.f32 %v653_v50, %v614_v48  ;;  %v655_v53 = vpop.f32.mrb[5].mxu0  ;;  %v696_v54 = vpop.f32.mrb[5].mxu1  ;;  %v703_v63 = vadd.f32 %v694_v51, %v616_v55  ;;  %v200_v55 = vld [vmem:[%s199_s7] ss:$8 sm:$0xf] }
 0x236   :  { %v702_v56 = vadd.f32 %v655_v53, %v615_v49  ;;  %v657_v57 = vpop.f32.mrb[6].mxu0  ;;  %v698_v58 = vpop.f32.mrb[6].mxu1  ;;  %v704_v28 = vadd.f32 %v696_v54, %v617_v21  ;;  %202 = vst.msk [vmem:[#allocation2 + $0x61] ss:$8 sm:$0xf] %vm2213_vm0, %v200_v55 }
 0x237   :  { %v705_v59 = vmul.f32 0.5, %v701_v52  ;;  %v658_v60 = vpop.f32.mrb[7].mxu0  ;;  %v699_v61 = vpop.f32.mrb[7].mxu1  ;;  %v727_v57 = vld [vmem:[#allocation2 + $0x48] sm:$0xff] }
 0x238   :  { %v709_v62 = vmul.f32 0.5, %v702_v56  ;;  %v714_v30 = vmul.f32 0.5, %v704_v28  ;;  %v726_v56 = vld [vmem:[#allocation2 + $0x40] sm:$0xff] }
 0x239   :  { %1805 = vtanh.f32 %v705_v59 }
 0x23a   :  { %1807 = vtanh.f32 %v709_v62 }
 0x23b   :  { %1809 = vtanh.f32 %v703_v63  ;;  %v728_v63 = vld [vmem:[#allocation2 + $0x50] sm:$0xff] }
 0x23c   :  { %1811 = vtanh.f32 %v714_v30 }
 0x243   :  { %v1806_v38 = vpop.eup %1805 }
 0x244   :  { %v1808_v40 = vpop.eup %1807  ;;  %v707_v41 = vmul.f32 0.5, %v1806_v38 }
 0x245   :  { %v711_v42 = vmul.f32 0.5, %v1808_v40  ;;  %v1810_v44 = vpop.eup %1809 }
 0x246   :  { %v708_v43 = vadd.f32 0.5, %v707_v41  ;;  %v1812_v49 = vpop.eup %1811 }
 0x247   :  { %v712_v45 = vadd.f32 0.5, %v711_v42  ;;  %v716_v50 = vmul.f32 0.5, %v1812_v49 }
 0x248   :  { %v719_v46 = vmul.f32 %v1810_v44, %v708_v43  ;;  %v729_v44 = vld [vmem:[#allocation2 + $0x58] sm:$0xff] }
 0x249   :  { %v718_v47 = vmul.f32 %v712_v45, %v2294_v39  ;;  %v717_v51 = vadd.f32 0.5, %v716_v50  ;;  %v187_v39 = vld [vmem:[%s186_s30] ss:$8 sm:$0xf]  ;;  %s257_s30 = sshra.s32 %s1595_s28, 3 }
 0x24a   :  { %189 = vst.msk [vmem:[#allocation2 + $0x60] ss:$8 sm:$0xf] %vm2213_vm0, %v187_v39  ;;  %s1652_s7 = sshll.u32 %s257_s30, 5 }
 0x24b   :  { %v2336_v48 = vadd.f32 %v719_v46, %v718_v47  ;;  %s263_s9 = sadd.s32 %s1652_s7, %s260_s6 }
 0x24c   :  { %s264_s0 = scalar_lea.vmem [#allocation5], %s263_s9 }
 0x24d   :  { %1813 = vtanh.f32 %v2336_v48 }
 0x257   :  { %v1814_v52 = vpop.eup %1813 }
 0x258   :  { %v722_v53 = vmul.f32 %v1814_v52, %v717_v51 }
 0x25a   :  { %v730_v54 = vpack.c.bf16 %v722_v53, %v722_v53 }
 0x25c   :  { %764 = vmatmul.mubr.bf16.vlgmr.msra.gmra.mrb[8].mxu0 %v730_v54  ;;  %805 = vmatmul.mubr.bf16.vlgmr.msra.gmra.mrb[8].mxu1 %v730_v54 }
 0x25d   :  { %844 = vmatpush1.bf16.msra.mxu0 %v2142_v3  ;;  %885 = vmatpush1.bf16.msra.mxu1 %v2156_v7 }
 0x25e   :  { %845 = vmatprep.subr.bf16.mxu0 %v2147_v4  ;;  %886 = vmatprep.subr.bf16.mxu1 %v2162_v9 }
 0x25f   :  { %875 = vmatprep.mubr.bf16.mxu0 %v2023_v0  ;;  %916 = vmatprep.mubr.bf16.mxu1 %v2023_v0 }
 0x261   :  { %846 = vmatpush1.bf16.msra.mxu0 %v2154_v6  ;;  %887 = vmatpush1.bf16.msra.mxu1 %v2165_v10 }
 0x262   :  { %847 = vmatprep.subr.bf16.mxu0 %v2159_v8  ;;  %888 = vmatprep.subr.bf16.mxu1 %v2174_v13 }
 0x265   :  { %848 = vmatpush1.bf16.msra.mxu0 %v2169_v11  ;;  %889 = vmatpush1.bf16.msra.mxu1 %v2178_v14 }
 0x266   :  { %849 = vmatprep.subr.bf16.mxu0 %v2172_v12  ;;  %890 = vmatprep.subr.bf16.mxu1 %v2185_v16 }
 0x269   :  { %850 = vmatpush1.bf16.msra.mxu0 %v2183_v15  ;;  %891 = vmatpush1.bf16.msra.mxu1 %v2195_v19 }
 0x26a   :  { %851 = vmatprep.subr.bf16.mxu0 %v2188_v17  ;;  %892 = vmatprep.subr.bf16.mxu1 %v2199_v20 }
 0x26d   :  { %852 = vmatpush1.bf16.msra.mxu0 %v2193_v18  ;;  %893 = vmatpush1.bf16.msra.mxu1 %v2205_v23 }
 0x26e   :  { %853 = vmatprep.subr.bf16.mxu0 %v2202_v22  ;;  %894 = vmatprep.subr.bf16.mxu1 %v2211_v25 }
 0x271   :  { %854 = vmatpush1.bf16.msra.mxu0 %v2209_v24  ;;  %895 = vmatpush1.bf16.msra.mxu1 %v2221_v29 }
 0x272   :  { %855 = vmatprep.subr.bf16.mxu0 %v2218_v27  ;;  %896 = vmatprep.subr.bf16.mxu1 %v2229_v32 }
 0x275   :  { %856 = vmatpush1.bf16.msra.mxu0 %v2227_v31  ;;  %897 = vmatpush1.bf16.msra.mxu1 %v2237_v34 }
 0x276   :  { %857 = vmatprep.subr.bf16.mxu0 %v2234_v33  ;;  %898 = vmatprep.subr.bf16.mxu1 %v2243_v36 }
 0x279   :  { %858 = vmatpush1.bf16.msra.mxu0 %v2241_v35  ;;  %899 = vmatpush1.bf16.msra.mxu1 %v2247_v37 }
 0x27a   :  { %955 = vmatprep.subr.bf16.mxu0 %v2140_v2  ;;  %996 = vmatprep.subr.bf16.mxu1 %v2152_v5 }
 0x32f   :  { %v765_v58 = vpop.f32.mrb[8].mxu0  ;;  %v806_v59 = vpop.f32.mrb[8].mxu1 }
 0x330   :  { %v813_v60 = vadd.f32 %v765_v58, %v726_v56  ;;  %v767_v61 = vpop.f32.mrb[9].mxu0  ;;  %v808_v62 = vpop.f32.mrb[9].mxu1  ;;  %v815_v43 = vadd.f32 %v806_v59, %v728_v63  ;;  %v226_v63 = vld [vmem:[%s225_s16] ss:$8 sm:$0xf] }
 0x331   :  { %v814_v21 = vadd.f32 %v767_v61, %v727_v57  ;;  %v769_v28 = vpop.f32.mrb[10].mxu0  ;;  %v810_v30 = vpop.f32.mrb[10].mxu1  ;;  %v816_v45 = vadd.f32 %v808_v62, %v729_v44  ;;  %228 = vst.msk [vmem:[#allocation2 + $0x81] ss:$8 sm:$0xf] %vm2213_vm0, %v226_v63 }
 0x332   :  { %v817_v38 = vmul.f32 0.5, %v813_v60  ;;  %v770_v40 = vpop.f32.mrb[11].mxu0  ;;  %v811_v41 = vpop.f32.mrb[11].mxu1 }
 0x333   :  { %v821_v42 = vmul.f32 0.5, %v814_v21  ;;  %v826_v46 = vmul.f32 0.5, %v816_v45  ;;  %v839_v21 = vld [vmem:[#allocation2 + $0x68] sm:$0xff] }
 0x334   :  { %1815 = vtanh.f32 %v817_v38 }
 0x335   :  { %1817 = vtanh.f32 %v821_v42  ;;  %v840_v42 = vld [vmem:[#allocation2 + $0x70] sm:$0xff] }
 0x336   :  { %1819 = vtanh.f32 %v815_v43 }
 0x337   :  { %1821 = vtanh.f32 %v826_v46 }
 0x33e   :  { %v1816_v47 = vpop.eup %1815 }
 0x33f   :  { %v1818_v49 = vpop.eup %1817  ;;  %v819_v50 = vmul.f32 0.5, %v1816_v47 }
 0x340   :  { %v823_v51 = vmul.f32 0.5, %v1818_v49  ;;  %v1820_v53 = vpop.eup %1819 }
 0x341   :  { %v820_v52 = vadd.f32 0.5, %v819_v50  ;;  %v1822_v57 = vpop.eup %1821 }
 0x342   :  { %v824_v54 = vadd.f32 0.5, %v823_v51  ;;  %v828_v58 = vmul.f32 0.5, %v1822_v57 }
 0x343   :  { %v831_v39 = vmul.f32 %v1820_v53, %v820_v52  ;;  %v841_v52 = vld [vmem:[#allocation2 + $0x78] sm:$0xff] }
 0x344   :  { %v830_v55 = vmul.f32 %v824_v54, %v2336_v48  ;;  %v829_v59 = vadd.f32 0.5, %v828_v58  ;;  %v213_v48 = vld [vmem:[%s212_s15] ss:$8 sm:$0xf]  ;;  %s283_s15 = sshra.s32 %s1601_s13, 3 }
 0x345   :  { %215 = vst.msk [vmem:[#allocation2 + $0x80] ss:$8 sm:$0xf] %vm2213_vm0, %v213_v48  ;;  %s1654_s16 = sshll.u32 %s283_s15, 5 }
 0x346   :  { %v2378_v56 = vadd.f32 %v831_v39, %v830_v55  ;;  %s289_s18 = sadd.s32 %s1654_s16, %s286_s3 }
 0x347   :  { %s290_s21 = scalar_lea.vmem [#allocation5], %s289_s18 }
 0x348   :  { %1823 = vtanh.f32 %v2378_v56 }
 0x352   :  { %v1824_v60 = vpop.eup %1823 }
 0x353   :  { %v834_v61 = vmul.f32 %v1824_v60, %v829_v59 }
 0x355   :  { %v842_v62 = vpack.c.bf16 %v834_v61, %v834_v61 }
 0x357   :  { %876 = vmatmul.mubr.bf16.vlgmr.msra.gmra.mrb[12].mxu0 %v842_v62  ;;  %917 = vmatmul.mubr.bf16.vlgmr.msra.gmra.mrb[12].mxu1 %v842_v62 }
 0x358   :  { %956 = vmatpush1.bf16.msra.mxu0 %v2142_v3  ;;  %997 = vmatpush1.bf16.msra.mxu1 %v2156_v7 }
 0x359   :  { %957 = vmatprep.subr.bf16.mxu0 %v2147_v4  ;;  %998 = vmatprep.subr.bf16.mxu1 %v2162_v9 }
 0x35a   :  { %987 = vmatprep.mubr.bf16.mxu0 %v2023_v0  ;;  %1028 = vmatprep.mubr.bf16.mxu1 %v2023_v0 }
 0x35c   :  { %958 = vmatpush1.bf16.msra.mxu0 %v2154_v6  ;;  %999 = vmatpush1.bf16.msra.mxu1 %v2165_v10 }
 0x35d   :  { %959 = vmatprep.subr.bf16.mxu0 %v2159_v8  ;;  %1000 = vmatprep.subr.bf16.mxu1 %v2174_v13 }
 0x360   :  { %960 = vmatpush1.bf16.msra.mxu0 %v2169_v11  ;;  %1001 = vmatpush1.bf16.msra.mxu1 %v2178_v14 }
 0x361   :  { %961 = vmatprep.subr.bf16.mxu0 %v2172_v12  ;;  %1002 = vmatprep.subr.bf16.mxu1 %v2185_v16 }
 0x364   :  { %962 = vmatpush1.bf16.msra.mxu0 %v2183_v15  ;;  %1003 = vmatpush1.bf16.msra.mxu1 %v2195_v19 }
 0x365   :  { %963 = vmatprep.subr.bf16.mxu0 %v2188_v17  ;;  %1004 = vmatprep.subr.bf16.mxu1 %v2199_v20 }
 0x368   :  { %964 = vmatpush1.bf16.msra.mxu0 %v2193_v18  ;;  %1005 = vmatpush1.bf16.msra.mxu1 %v2205_v23 }
 0x369   :  { %965 = vmatprep.subr.bf16.mxu0 %v2202_v22  ;;  %1006 = vmatprep.subr.bf16.mxu1 %v2211_v25 }
 0x36c   :  { %966 = vmatpush1.bf16.msra.mxu0 %v2209_v24  ;;  %1007 = vmatpush1.bf16.msra.mxu1 %v2221_v29 }
 0x36d   :  { %967 = vmatprep.subr.bf16.mxu0 %v2218_v27  ;;  %1008 = vmatprep.subr.bf16.mxu1 %v2229_v32 }
 0x370   :  { %968 = vmatpush1.bf16.msra.mxu0 %v2227_v31  ;;  %1009 = vmatpush1.bf16.msra.mxu1 %v2237_v34 }
 0x371   :  { %969 = vmatprep.subr.bf16.mxu0 %v2234_v33  ;;  %1010 = vmatprep.subr.bf16.mxu1 %v2243_v36 }
 0x374   :  { %970 = vmatpush1.bf16.msra.mxu0 %v2241_v35  ;;  %1011 = vmatpush1.bf16.msra.mxu1 %v2247_v37 }
 0x375   :  { %1067 = vmatprep.subr.bf16.mxu0 %v2140_v2  ;;  %1108 = vmatprep.subr.bf16.mxu1 %v2152_v5  ;;  %v838_v2 = vld [vmem:[#allocation2 + $0x60] sm:$0xff] }
 0x42a   :  { %v877_v28 = vpop.f32.mrb[12].mxu0  ;;  %v918_v30 = vpop.f32.mrb[12].mxu1 }
 0x42b   :  { %v925_v38 = vadd.f32 %v877_v28, %v838_v2  ;;  %v879_v40 = vpop.f32.mrb[13].mxu0  ;;  %v920_v41 = vpop.f32.mrb[13].mxu1  ;;  %v927_v51 = vadd.f32 %v918_v30, %v840_v42 }
 0x42c   :  { %v926_v43 = vadd.f32 %v879_v40, %v839_v21  ;;  %v881_v44 = vpop.f32.mrb[14].mxu0  ;;  %v922_v45 = vpop.f32.mrb[14].mxu1  ;;  %v928_v53 = vadd.f32 %v920_v41, %v841_v52 }
 0x42d   :  { %v929_v46 = vmul.f32 0.5, %v925_v38  ;;  %v882_v47 = vpop.f32.mrb[15].mxu0  ;;  %v923_v49 = vpop.f32.mrb[15].mxu1 }
 0x42e   :  { %v933_v50 = vmul.f32 0.5, %v926_v43  ;;  %v938_v54 = vmul.f32 0.5, %v928_v53 }
 0x42f   :  { %1825 = vtanh.f32 %v929_v46 }
 0x430   :  { %1827 = vtanh.f32 %v933_v50 }
 0x431   :  { %1829 = vtanh.f32 %v927_v51 }
 0x432   :  { %1831 = vtanh.f32 %v938_v54 }
 0x439   :  { %v1826_v39 = vpop.eup %1825 }
 0x43a   :  { %v1828_v55 = vpop.eup %1827  ;;  %v931_v57 = vmul.f32 0.5, %v1826_v39 }
 0x43b   :  { %v935_v58 = vmul.f32 0.5, %v1828_v55  ;;  %v1830_v60 = vpop.eup %1829  ;;  %v2467_v55 = vld [vmem:[#allocation8] ss:$16 sps:$4 sm:$0xff]  }
 0x43c   :  { %v932_v59 = vadd.f32 0.5, %v931_v57  ;;  %v1832_v2 = vpop.eup %1831  ;;  %v2470_v57 = vld [vmem:[#allocation8 + $0x8] ss:$16 sps:$4 sm:$0xff]  }
 0x43d   :  { %v936_v61 = vadd.f32 0.5, %v935_v58  ;;  %v940_v21 = vmul.f32 0.5, %v1832_v2  ;;  %v2473_v58 = vld [vmem:[#allocation8 + $0x24] ss:$16 sps:$4 sm:$0xff]   ;;  %v2496_v2 = vld [vmem:[#allocation8 + $0x48] ss:$16 sps:$4 sm:$0xff]  }
 0x43e   :  { %v943_v62 = vmul.f32 %v1830_v60, %v932_v59  ;;  %v2476_v59 = vld [vmem:[#allocation8 + $0x2c] ss:$16 sps:$4 sm:$0xff]   ;;  %v2481_v60 = vld [vmem:[#allocation8 + $0x20] ss:$16 sps:$4 sm:$0xff]  }
 0x43f   :  { %v942_v48 = vmul.f32 %v936_v61, %v2378_v56  ;;  %v941_v28 = vadd.f32 0.5, %v940_v21  ;;  %v2484_v61 = vld [vmem:[#allocation8 + $0x28] ss:$16 sps:$4 sm:$0xff]   ;;  %v2499_v21 = vld [vmem:[#allocation8 + $0x64] ss:$16 sps:$4 sm:$0xff]  }
 0x441   :  { %v2420_v63 = vadd.f32 %v943_v62, %v942_v48  ;;  %v2487_v62 = vld [vmem:[#allocation8 + $0x44] ss:$16 sps:$4 sm:$0xff]   ;;  %v2490_v48 = vld [vmem:[#allocation8 + $0x4c] ss:$16 sps:$4 sm:$0xff]  }
 0x443   :  { %1833 = vtanh.f32 %v2420_v63 }
 0x44d   :  { %v1834_v30 = vpop.eup %1833 }
 0x44e   :  { %v946_v38 = vmul.f32 %v1834_v30, %v941_v28  ;;  %v2502_v28 = vld [vmem:[#allocation8 + $0x6c] ss:$16 sps:$4 sm:$0xff]   ;;  %v2505_v30 = vld [vmem:[#allocation8 + $0x60] ss:$16 sps:$4 sm:$0xff]  }
 0x450   :  { %v954_v40 = vpack.c.bf16 %v946_v38, %v946_v38  ;;  %v2508_v38 = vld [vmem:[#allocation8 + $0x68] ss:$16 sps:$4 sm:$0xff]  }
 0x452   :  { %988 = vmatmul.mubr.bf16.vlgmr.msra.gmra.mrb[16].mxu0 %v954_v40  ;;  %1029 = vmatmul.mubr.bf16.vlgmr.msra.gmra.mrb[16].mxu1 %v954_v40  ;;  %v2511_v40 = vld [vmem:[#allocation8 + $0x84] ss:$16 sps:$4 sm:$0xff]  }
 0x453   :  { %1068 = vmatpush1.bf16.msra.mxu0 %v2142_v3  ;;  %1109 = vmatpush1.bf16.msra.mxu1 %v2156_v7  ;;  %v2455_v3 = vld [vmem:[#allocation8 + $0x4] ss:$16 sps:$4 sm:$0xff]   ;;  %v951_v7 = vld [vmem:[#allocation2 + $0x88] sm:$0xff] }
 0x454   :  { %1069 = vmatprep.subr.bf16.mxu0 %v2147_v4  ;;  %1110 = vmatprep.subr.bf16.mxu1 %v2162_v9  ;;  %v239_v4 = vld [vmem:[%s238_s2] ss:$8 sm:$0xf]  ;;  %s2027_s2 = smov [#allocation11]  }
 0x455   :  { %1099 = vmatprep.mubr.bf16.mxu0 %v2023_v0  ;;  %1140 = vmatprep.mubr.bf16.mxu1 %v2023_v0  ;;  %241 = vst.msk [vmem:[#allocation2 + $0xa0] ss:$8 sm:$0xf] %vm2213_vm0, %v239_v4  ;;  %v2514_v4 = vld [vmem:[#allocation8 + $0x8c] ss:$16 sps:$4 sm:$0xff]   ;;  %s1495_s26 = sshll.u32 %s2027_s2, 4  ;;  %s1496_s26 = int_to_ptr.vmem [resolvable:$true] %s1495_s26 }
 0x456   :  { %p1988_p0 = scmp.lt.s32.totalorder %s1496_s26, %s1496_s26 }
 0x457   :  { %1070 = vmatpush1.bf16.msra.mxu0 %v2154_v6  ;;  %1111 = vmatpush1.bf16.msra.mxu1 %v2165_v10  ;;  %v252_v6 = vld [vmem:[%s251_s27] ss:$8 sm:$0xf]  ;;  %s1983_s27 = scalar_lea.vmem %s1496_s26, 128 }
 0x458   :  { %1071 = vmatprep.subr.bf16.mxu0 %v2159_v8  ;;  %1112 = vmatprep.subr.bf16.mxu1 %v2174_v13  ;;  %254 = vst.msk [vmem:[#allocation2 + $0xa1] ss:$8 sm:$0xf] %vm2213_vm0, %v252_v6  ;;  %v952_v13 = vld [vmem:[#allocation2 + $0x90] sm:$0xff]  ;;  %p1984_p13 = scmp.ne.s32.totalorder %s1496_s26, %s1983_s27  ;;  %p1989_p1 = scmp.lt.s32.totalorder %s1983_s27, %s1983_s27 }
 0x459   :  { %v2517_v6 = vld [vmem:[#allocation8 + $0x80] ss:$16 sps:$4 sm:$0xff]  }
 0x45a   :  { %p1990_p2 = por %p1989_p1, %p1988_p0 }
 0x45b   :  { %1072 = vmatpush1.bf16.msra.mxu0 %v2169_v11  ;;  %1113 = vmatpush1.bf16.msra.mxu1 %v2178_v14 }
 0x45c   :  { %1073 = vmatprep.subr.bf16.mxu0 %v2172_v12  ;;  %1114 = vmatprep.subr.bf16.mxu1 %v2185_v16  ;;  %p1991_p3 = pnand %p1990_p2, %p1984_p13 }
 0x45f   :  { %1074 = vmatpush1.bf16.msra.mxu0 %v2183_v15  ;;  %1115 = vmatpush1.bf16.msra.mxu1 %v2195_v19 }
 0x460   :  { %1075 = vmatprep.subr.bf16.mxu0 %v2188_v17  ;;  %1116 = vmatprep.subr.bf16.mxu1 %v2199_v20 }
 0x463   :  { %1076 = vmatpush1.bf16.msra.mxu0 %v2193_v18  ;;  %1117 = vmatpush1.bf16.msra.mxu1 %v2205_v23  ;;  %v953_v23 = vld [vmem:[#allocation2 + $0x98] sm:$0xff] }
 0x464   :  { %1077 = vmatprep.subr.bf16.mxu0 %v2202_v22  ;;  %1118 = vmatprep.subr.bf16.mxu1 %v2211_v25 }
 0x467   :  { %1078 = vmatpush1.bf16.msra.mxu0 %v2209_v24  ;;  %1119 = vmatpush1.bf16.msra.mxu1 %v2221_v29 }
 0x468   :  { %1079 = vmatprep.subr.bf16.mxu0 %v2218_v27  ;;  %1120 = vmatprep.subr.bf16.mxu1 %v2229_v32 }
 0x46b   :  { %1080 = vmatpush1.bf16.msra.mxu0 %v2227_v31  ;;  %1121 = vmatpush1.bf16.msra.mxu1 %v2237_v34 }
 0x46c   :  { %1081 = vmatprep.subr.bf16.mxu0 %v2234_v33  ;;  %1122 = vmatprep.subr.bf16.mxu1 %v2243_v36 }
 0x46f   :  { %1082 = vmatpush1.bf16.msra.mxu0 %v2241_v35  ;;  %1123 = vmatpush1.bf16.msra.mxu1 %v2247_v37 }
 0x470   :  { %1179 = vmatprep.subr.bf16.mxu0 %v2455_v3  ;;  %1220 = vmatprep.subr.bf16.mxu1 %v2152_v5  ;;  %v950_v5 = vld [vmem:[#allocation2 + $0x80] sm:$0xff] }
 0x525   :  { %v989_v8 = vpop.f32.mrb[16].mxu0  ;;  %v1030_v9 = vpop.f32.mrb[16].mxu1 }
 0x526   :  { %v1037_v10 = vadd.f32 %v989_v8, %v950_v5  ;;  %v991_v11 = vpop.f32.mrb[17].mxu0  ;;  %v1032_v12 = vpop.f32.mrb[17].mxu1  ;;  %v1039_v22 = vadd.f32 %v1030_v9, %v952_v13  ;;  %v2520_v5 = vld [vmem:[#allocation8 + $0x88] ss:$16 sps:$4 sm:$0xff]   ;;  %v2526_v8 = vld [vmem:[#allocation8 + $0xac] ss:$16 sps:$4 sm:$0xff]  }
 0x527   :  { %v1038_v14 = vadd.f32 %v991_v11, %v951_v7  ;;  %v993_v15 = vpop.f32.mrb[18].mxu0  ;;  %v1034_v16 = vpop.f32.mrb[18].mxu1  ;;  %v1040_v24 = vadd.f32 %v1032_v12, %v953_v23  ;;  %v2523_v7 = vld [vmem:[#allocation8 + $0xa4] ss:$16 sps:$4 sm:$0xff]   ;;  %v2529_v9 = vld [vmem:[#allocation8 + $0xa0] ss:$16 sps:$4 sm:$0xff]  }
 0x528   :  { %v1041_v17 = vmul.f32 0.5, %v1037_v10  ;;  %v994_v18 = vpop.f32.mrb[19].mxu0  ;;  %v1035_v19 = vpop.f32.mrb[19].mxu1  ;;  %v2533_v10 = vld [vmem:[#allocation8 + $0xc4] ss:$16 sps:$4 sm:$0xff]  }
 0x529   :  { %v1045_v20 = vmul.f32 0.5, %v1038_v14  ;;  %v1050_v25 = vmul.f32 0.5, %v1040_v24  ;;  %v1064_v12 = vld [vmem:[#allocation2 + $0xb0] sm:$0xff] }
 0x52a   :  { %1835 = vtanh.f32 %v1041_v17 }
 0x52b   :  { %1837 = vtanh.f32 %v1045_v20 }
 0x52c   :  { %1839 = vtanh.f32 %v1039_v22  ;;  %v1065_v22 = vld [vmem:[#allocation2 + $0xb8] sm:$0xff] }
 0x52d   :  { %1841 = vtanh.f32 %v1050_v25 }
 0x534   :  { %v1836_v27 = vpop.eup %1835 }
 0x535   :  { %v1838_v56 = vpop.eup %1837  ;;  %v1043_v41 = vmul.f32 0.5, %v1836_v27 }
 0x536   :  { %v1047_v42 = vmul.f32 0.5, %v1838_v56  ;;  %v1840_v44 = vpop.eup %1839 }
 0x537   :  { %v1044_v43 = vadd.f32 0.5, %v1043_v41  ;;  %v1842_v50 = vpop.eup %1841 }
 0x538   :  { %v1048_v45 = vadd.f32 0.5, %v1047_v42  ;;  %v1052_v51 = vmul.f32 0.5, %v1842_v50 }
 0x539   :  { %v1055_v46 = vmul.f32 %v1840_v44, %v1044_v43 }
 0x53a   :  { %v1054_v47 = vmul.f32 %v1048_v45, %v2420_v63  ;;  %v1053_v52 = vadd.f32 0.5, %v1052_v51  ;;  %v2493_v63 = vld [vmem:[#allocation8 + $0x40] ss:$16 sps:$4 sm:$0xff]  }
 0x53c   :  { %v2464_v49 = vadd.f32 %v1055_v46, %v1054_v47 }
 0x53e   :  { %1843 = vtanh.f32 %v2464_v49 }
 0x548   :  { %v1844_v53 = vpop.eup %1843 }
 0x549   :  { %v1058_v54 = vmul.f32 %v1844_v53, %v1053_v52 }
 0x54b   :  { %v1066_v39 = vpack.c.bf16 %v1058_v54, %v1058_v54 }
 0x54d   :  { %1100 = vmatmul.mubr.bf16.vlgmr.msra.gmra.mrb[20].mxu0 %v1066_v39  ;;  %1141 = vmatmul.mubr.bf16.vlgmr.msra.gmra.mrb[20].mxu1 %v1066_v39 }
 0x54e   :  { %1180 = vmatpush1.bf16.msra.mxu0 %v2467_v55  ;;  %1221 = vmatpush1.bf16.msra.mxu1 %v2470_v57 }
 0x54f   :  { %1181 = vmatprep.subr.bf16.mxu0 %v2473_v58  ;;  %1222 = vmatprep.subr.bf16.mxu1 %v2476_v59 }
 0x550   :  { %1211 = vmatprep.mubr.bf16.mxu0 %v2023_v0  ;;  %1252 = vmatprep.mubr.bf16.mxu1 %v2023_v0 }
 0x552   :  { %1182 = vmatpush1.bf16.msra.mxu0 %v2481_v60  ;;  %1223 = vmatpush1.bf16.msra.mxu1 %v2484_v61 }
 0x553   :  { %1183 = vmatprep.subr.bf16.mxu0 %v2487_v62  ;;  %1224 = vmatprep.subr.bf16.mxu1 %v2490_v48 }
 0x556   :  { %1184 = vmatpush1.bf16.msra.mxu0 %v2493_v63  ;;  %1225 = vmatpush1.bf16.msra.mxu1 %v2496_v2 }
 0x557   :  { %1185 = vmatprep.subr.bf16.mxu0 %v2499_v21  ;;  %1226 = vmatprep.subr.bf16.mxu1 %v2502_v28 }
 0x55a   :  { %1186 = vmatpush1.bf16.msra.mxu0 %v2505_v30  ;;  %1227 = vmatpush1.bf16.msra.mxu1 %v2508_v38 }
 0x55b   :  { %1187 = vmatprep.subr.bf16.mxu0 %v2511_v40  ;;  %1228 = vmatprep.subr.bf16.mxu1 %v2514_v4 }
 0x55e   :  { %1188 = vmatpush1.bf16.msra.mxu0 %v2517_v6  ;;  %1229 = vmatpush1.bf16.msra.mxu1 %v2520_v5 }
 0x55f   :  { %1189 = vmatprep.subr.bf16.mxu0 %v2523_v7  ;;  %1230 = vmatprep.subr.bf16.mxu1 %v2526_v8 }
 0x562   :  { %1190 = vmatpush1.bf16.msra.mxu0 %v2529_v9  ;;  %1231 = vmatpush1.bf16.msra.mxu1 %v2221_v29  ;;  %v1898_v29 = vld [vmem:[#allocation8 + $0xc] ss:$16 sps:$4 sm:$0xff]  }
 0x563   :  { %1191 = vmatprep.subr.bf16.mxu0 %v2533_v10  ;;  %1232 = vmatprep.subr.bf16.mxu1 %v2229_v32  ;;  %v278_v32 = vld [vmem:[%s277_s1] ss:$8 sm:$0xf] }
 0x564   :  { %280 = vst.msk [vmem:[#allocation2 + $0xc1] ss:$8 sm:$0xf] %vm2213_vm0, %v278_v32 }
 0x566   :  { %1192 = vmatpush1.bf16.msra.mxu0 %v2227_v31  ;;  %1233 = vmatpush1.bf16.msra.mxu1 %v2237_v34  ;;  %v265_v31 = vld [vmem:[%s264_s0] ss:$8 sm:$0xf] }
 0x567   :  { %1193 = vmatprep.subr.bf16.mxu0 %v2234_v33  ;;  %1234 = vmatprep.subr.bf16.mxu1 %v2243_v36  ;;  %267 = vst.msk [vmem:[#allocation2 + $0xc0] ss:$8 sm:$0xf] %vm2213_vm0, %v265_v31  ;;  %v1062_v33 = vld [vmem:[#allocation2 + $0xa0] sm:$0xff]  ;;  %v1063_v34 = vld [vmem:[#allocation2 + $0xa8] sm:$0xff] }
 0x56a   :  { %1194 = vmatpush1.bf16.msra.mxu0 %v2241_v35  ;;  %1235 = vmatpush1.bf16.msra.mxu1 %v2247_v37 }
 0x56b   :  { %1291 = vmatprep.subr.bf16.mxu0 %v2455_v3  ;;  %1332 = vmatprep.subr.bf16.mxu1 %v1898_v29 }
 0x56e   :  { %v1177_v26 = vld [vmem:[#allocation2 + $0xd8] sm:$0xff] }
 0x620   :  { %v1101_v35 = vpop.f32.mrb[20].mxu0  ;;  %v1142_v36 = vpop.f32.mrb[20].mxu1 }
 0x621   :  { %v1149_v37 = vadd.f32 %v1101_v35, %v1062_v33  ;;  %v1103_v3 = vpop.f32.mrb[21].mxu0  ;;  %v1144_v11 = vpop.f32.mrb[21].mxu1  ;;  %v1151_v20 = vadd.f32 %v1142_v36, %v1064_v12 }
 0x622   :  { %v1150_v13 = vadd.f32 %v1103_v3, %v1063_v34  ;;  %v1105_v14 = vpop.f32.mrb[22].mxu0  ;;  %v1146_v15 = vpop.f32.mrb[22].mxu1  ;;  %v1152_v23 = vadd.f32 %v1144_v11, %v1065_v22 }
 0x623   :  { %v1153_v16 = vmul.f32 0.5, %v1149_v37  ;;  %v1106_v17 = vpop.f32.mrb[23].mxu0  ;;  %v1147_v18 = vpop.f32.mrb[23].mxu1 }
 0x624   :  { %v1157_v19 = vmul.f32 0.5, %v1150_v13  ;;  %v1162_v24 = vmul.f32 0.5, %v1152_v23  ;;  %v1395_v23 = vld [vmem:[#allocation10] sm:$0xff] }
 0x625   :  { %1845 = vtanh.f32 %v1153_v16 }
 0x626   :  { %1847 = vtanh.f32 %v1157_v19 }
 0x627   :  { %1849 = vtanh.f32 %v1151_v20 }
 0x628   :  { %1851 = vtanh.f32 %v1162_v24  ;;  %v1396_v24 = vld [vmem:[#allocation10 + $0x8] sm:$0xff] }
 0x62f   :  { %v1846_v25 = vpop.eup %1845 }
 0x630   :  { %v1848_v27 = vpop.eup %1847  ;;  %v1155_v56 = vmul.f32 0.5, %v1846_v25  ;;  %v1709_v25 = vpack.c.bf16 %v1396_v24, %v1395_v23 }
 0x631   :  { %v1159_v41 = vmul.f32 0.5, %v1848_v27  ;;  %v1850_v43 = vpop.eup %1849  ;;  %v2025_v27 = vmov 0.0|0.0  }
 0x632   :  { %v1156_v42 = vadd.f32 0.5, %v1155_v56  ;;  %v1852_v50 = vpop.eup %1851  ;;  %v1397_v56 = vld [vmem:[#allocation10 + $0x10] sm:$0xff] }
 0x633   :  { %v1160_v44 = vadd.f32 0.5, %v1159_v41  ;;  %v1164_v51 = vmul.f32 0.5, %v1852_v50  ;;  %v1398_v41 = vld [vmem:[#allocation10 + $0x18] sm:$0xff] }
 0x634   :  { %v1167_v45 = vmul.f32 %v1850_v43, %v1156_v42  ;;  %v1712_v42 = vpack.c.bf16 %v1398_v41, %v1397_v56  ;;  %v1399_v43 = vld [vmem:[#allocation10 + $0x20] sm:$0xff] }
 0x635   :  { %v1166_v46 = vmul.f32 %v1160_v44, %v2464_v49  ;;  %v1165_v52 = vadd.f32 0.5, %v1164_v51  ;;  %v1900_v49 = vld [vmem:[#allocation8 + $0xcc] ss:$16 sps:$4 sm:$0xff]   ;;  %v1403_v51 = vld [vmem:[#allocation10 + $0x40] sm:$0xff] }
 0x636   :  { %v1400_v44 = vld [vmem:[#allocation10 + $0x28] sm:$0xff] }
 0x637   :  { %v2549_v47 = vadd.f32 %v1167_v45, %v1166_v46  ;;  %v1715_v45 = vpack.c.bf16 %v1400_v44, %v1399_v43  ;;  %v1401_v46 = vld [vmem:[#allocation10 + $0x30] sm:$0xff] }
 0x639   :  { %1853 = vtanh.f32 %v2549_v47 }
 0x643   :  { %v1854_v53 = vpop.eup %1853 }
 0x644   :  { %v1170_v54 = vmul.f32 %v1854_v53, %v1165_v52  ;;  %v1404_v52 = vld [vmem:[#allocation10 + $0x48] sm:$0xff] }
 0x645   :  { %v1721_v53 = vpack.c.bf16 %v1404_v52, %v1403_v51 }
 0x646   :  { %v1178_v39 = vpack.c.bf16 %v1170_v54, %v1170_v54  ;;  %v1405_v54 = vld [vmem:[#allocation10 + $0x50] sm:$0xff] }
 0x648   :  { %1212 = vmatmul.mubr.bf16.vlgmr.msra.gmra.mrb[24].mxu0 %v1178_v39  ;;  %1253 = vmatmul.mubr.bf16.vlgmr.msra.gmra.mrb[24].mxu1 %v1178_v39  ;;  %v1406_v39 = vld [vmem:[#allocation10 + $0x58] sm:$0xff] }
 0x649   :  { %1292 = vmatpush1.bf16.msra.mxu0 %v2467_v55  ;;  %1333 = vmatpush1.bf16.msra.mxu1 %v2470_v57  ;;  %v1901_v55 = vld [vmem:[#allocation8 + $0xc0] ss:$16 sps:$4 sm:$0xff]   ;;  %v1902_v57 = vld [vmem:[#allocation8 + $0xc8] ss:$16 sps:$4 sm:$0xff]  }
 0x64a   :  { %1293 = vmatprep.subr.bf16.mxu0 %v2473_v58  ;;  %1334 = vmatprep.subr.bf16.mxu1 %v2476_v59  ;;  %v1903_v58 = vld [vmem:[#allocation8 + $0xe4] ss:$16 sps:$4 sm:$0xff]   ;;  %v1904_v59 = vld [vmem:[#allocation8 + $0xec] ss:$16 sps:$4 sm:$0xff]  }
 0x64b   :  { %1323 = vmatprep.mubr.bf16.mxu0 %v2023_v0  ;;  %1364 = vmatprep.mubr.bf16.mxu1 %v2023_v0  ;;  %v1899_v0 = vld [vmem:[#allocation8 + $0xa8] ss:$16 sps:$4 sm:$0xff]  }
 0x64d   :  { %1294 = vmatpush1.bf16.msra.mxu0 %v2481_v60  ;;  %1335 = vmatpush1.bf16.msra.mxu1 %v2484_v61  ;;  %v1905_v60 = vld [vmem:[#allocation8 + $0xe0] ss:$16 sps:$4 sm:$0xff]   ;;  %v1906_v61 = vld [vmem:[#allocation8 + $0xe8] ss:$16 sps:$4 sm:$0xff]  }
 0x64e   :  { %1295 = vmatprep.subr.bf16.mxu0 %v2487_v62  ;;  %1336 = vmatprep.subr.bf16.mxu1 %v2490_v48  ;;  %v291_v62 = vld [vmem:[%s290_s21] ss:$8 sm:$0xf] }
 0x64f   :  { %293 = vst.msk [vmem:[#allocation2 + $0xe0] ss:$8 sm:$0xf] %vm2213_vm0, %v291_v62  ;;  %v304_v48 = vld [vmem:[%s303_s23] ss:$8 sm:$0xf] }
 0x650   :  { %306 = vst.msk [vmem:[#allocation2 + $0xe1] ss:$8 sm:$0xf] %vm2213_vm0, %v304_v48 }
 0x651   :  { %1296 = vmatpush1.bf16.msra.mxu0 %v2493_v63  ;;  %1337 = vmatpush1.bf16.msra.mxu1 %v2496_v2  ;;  %v1174_v63 = vld [vmem:[#allocation2 + $0xc0] sm:$0xff]  ;;  %v1175_v2 = vld [vmem:[#allocation2 + $0xc8] sm:$0xff] }
 0x652   :  { %1297 = vmatprep.subr.bf16.mxu0 %v2499_v21  ;;  %1338 = vmatprep.subr.bf16.mxu1 %v2502_v28 }
 0x655   :  { %1298 = vmatpush1.bf16.msra.mxu0 %v2505_v30  ;;  %1339 = vmatpush1.bf16.msra.mxu1 %v2508_v38 }
 0x656   :  { %1299 = vmatprep.subr.bf16.mxu0 %v2511_v40  ;;  %1340 = vmatprep.subr.bf16.mxu1 %v2514_v4  ;;  %v1176_v4 = vld [vmem:[#allocation2 + $0xd0] sm:$0xff] }
 0x657   :  { %v1287_v62 = vld [vmem:[#allocation2 + $0xe8] sm:$0xff] }
 0x659   :  { %1300 = vmatpush1.bf16.msra.mxu0 %v2517_v6  ;;  %1341 = vmatpush1.bf16.msra.mxu1 %v2520_v5 }
 0x65a   :  { %1301 = vmatprep.subr.bf16.mxu0 %v2523_v7  ;;  %1342 = vmatprep.subr.bf16.mxu1 %v2526_v8 }
 0x65d   :  { %1302 = vmatpush1.bf16.msra.mxu0 %v2529_v9  ;;  %1343 = vmatpush1.bf16.msra.mxu1 %v1899_v0  ;;  %v1724_v0 = vpack.c.bf16 %v1406_v39, %v1405_v54 }
 0x65e   :  { %1303 = vmatprep.subr.bf16.mxu0 %v2533_v10  ;;  %1344 = vmatprep.subr.bf16.mxu1 %v1900_v49  ;;  %v1407_v49 = vld [vmem:[#allocation10 + $0x60] sm:$0xff] }
 0x661   :  { %1304 = vmatpush1.bf16.msra.mxu0 %v1901_v55  ;;  %1345 = vmatpush1.bf16.msra.mxu1 %v1902_v57  ;;  %v1408_v55 = vld [vmem:[#allocation10 + $0x68] sm:$0xff] }
 0x662   :  { %1305 = vmatprep.subr.bf16.mxu0 %v1903_v58  ;;  %1346 = vmatprep.subr.bf16.mxu1 %v1904_v59  ;;  %v1727_v57 = vpack.c.bf16 %v1408_v55, %v1407_v49  ;;  %v1409_v58 = vld [vmem:[#allocation10 + $0x70] sm:$0xff]  ;;  %v1410_v59 = vld [vmem:[#allocation10 + $0x78] sm:$0xff] }
 0x665   :  { %1306 = vmatpush1.bf16.msra.mxu0 %v1905_v60  ;;  %1347 = vmatpush1.bf16.msra.mxu1 %v1906_v61  ;;  %v1730_v60 = vpack.c.bf16 %v1410_v59, %v1409_v58  ;;  %v1286_v61 = vld [vmem:[#allocation2 + $0xe0] sm:$0xff] }
 0x666   :  { %1708 = vmatprep.subr.bf16.mxu0 %v2025_v27 }
 0x71b   :  { %v1213_v21 = vpop.f32.mrb[24].mxu0  ;;  %v1254_v28 = vpop.f32.mrb[24].mxu1 }
 0x71c   :  { %v1261_v30 = vadd.f32 %v1213_v21, %v1174_v63  ;;  %v1215_v38 = vpop.f32.mrb[25].mxu0  ;;  %v1256_v40 = vpop.f32.mrb[25].mxu1  ;;  %v1263_v31 = vadd.f32 %v1254_v28, %v1176_v4 }
 0x71d   :  { %v1262_v6 = vadd.f32 %v1215_v38, %v1175_v2  ;;  %v1217_v5 = vpop.f32.mrb[26].mxu0  ;;  %v1258_v7 = vpop.f32.mrb[26].mxu1  ;;  %v1264_v32 = vadd.f32 %v1256_v40, %v1177_v26 }
 0x71e   :  { %v1265_v8 = vmul.f32 0.5, %v1261_v30  ;;  %v1218_v9 = vpop.f32.mrb[27].mxu0  ;;  %v1259_v10 = vpop.f32.mrb[27].mxu1  ;;  %v1288_v30 = vld [vmem:[#allocation2 + $0xf0] sm:$0xff] }
 0x71f   :  { %v1269_v29 = vmul.f32 0.5, %v1262_v6  ;;  %v1274_v33 = vmul.f32 0.5, %v1264_v32  ;;  %v1289_v10 = vld [vmem:[#allocation2 + $0xf8] sm:$0xff] }
 0x720   :  { %1855 = vtanh.f32 %v1265_v8 }
 0x721   :  { %1857 = vtanh.f32 %v1269_v29 }
 0x722   :  { %1859 = vtanh.f32 %v1263_v31 }
 0x723   :  { %1861 = vtanh.f32 %v1274_v33 }
 0x72a   :  { %v1856_v34 = vpop.eup %1855 }
 0x72b   :  { %v1858_v35 = vpop.eup %1857  ;;  %v1267_v36 = vmul.f32 0.5, %v1856_v34 }
 0x72c   :  { %v1271_v37 = vmul.f32 0.5, %v1858_v35  ;;  %v1860_v11 = vpop.eup %1859 }
 0x72d   :  { %v1268_v3 = vadd.f32 0.5, %v1267_v36  ;;  %v1862_v16 = vpop.eup %1861 }
 0x72e   :  { %v1272_v12 = vadd.f32 0.5, %v1271_v37  ;;  %v1276_v17 = vmul.f32 0.5, %v1862_v16 }
 0x72f   :  { %v1279_v13 = vmul.f32 %v1860_v11, %v1268_v3 }
 0x730   :  { %v1278_v14 = vmul.f32 %v1272_v12, %v2549_v47  ;;  %v1277_v18 = vadd.f32 0.5, %v1276_v17  ;;  %v1402_v47 = vld [vmem:[#allocation10 + $0x38] sm:$0xff] }
 0x731   :  { %v1718_v50 = vpack.c.bf16 %v1402_v47, %v1401_v46 }
 0x732   :  { %v2581_v15 = vadd.f32 %v1279_v13, %v1278_v14 }
 0x734   :  { %1863 = vtanh.f32 %v2581_v15 }
 0x73e   :  { %v1864_v19 = vpop.eup %1863 }
 0x73f   :  { %v1282_v20 = vmul.f32 %v1864_v19, %v1277_v18  ;;  %v1639_v18 = vld [vmem:[%s2605_s4] ss:$0 sm:$0xff] }
 0x741   :  { %v1290_v22 = vpack.c.bf16 %v1282_v20, %v1282_v20 }
 0x743   :  { %1324 = vmatmul.mubr.bf16.vlgmr.msra.gmra.mrb[28].mxu0 %v1290_v22  ;;  %1365 = vmatmul.mubr.bf16.vlgmr.msra.gmra.mrb[28].mxu1 %v1290_v22 }
 0x744   :  { %1710 = vmatpush3.bf16.msra.mxu0 %v1709_v25  ;;  %1705 = vmatprep.mubr.msk.f32.mxu0 %vm2026_vm1, %v2024_v1 }
 0x745   :  { %1711 = vmatprep.subr.bf16.mxu0 %v2025_v27 }
 0x748   :  { %1713 = vmatpush3.bf16.msra.mxu0 %v1712_v42 }
 0x749   :  { %1714 = vmatprep.subr.bf16.mxu0 %v2025_v27 }
 0x74c   :  { %1716 = vmatpush3.bf16.msra.mxu0 %v1715_v45 }
 0x74d   :  { %1717 = vmatprep.subr.bf16.mxu0 %v2025_v27 }
 0x750   :  { %1719 = vmatpush3.bf16.msra.mxu0 %v1718_v50 }
 0x751   :  { %1720 = vmatprep.subr.bf16.mxu0 %v2025_v27 }
 0x754   :  { %1722 = vmatpush3.bf16.msra.mxu0 %v1721_v53 }
 0x755   :  { %1723 = vmatprep.subr.bf16.mxu0 %v2025_v27 }
 0x758   :  { %1725 = vmatpush3.bf16.msra.mxu0 %v1724_v0 }
 0x759   :  { %1726 = vmatprep.subr.bf16.mxu0 %v2025_v27 }
 0x75c   :  { %1728 = vmatpush3.bf16.msra.mxu0 %v1727_v57 }
 0x75d   :  { %1729 = vmatprep.subr.bf16.mxu0 %v2025_v27 }
 0x760   :  { %1731 = vmatpush3.bf16.msra.mxu0 %v1730_v60 }
 0x816   :  { %v1325_v48 = vpop.f32.mrb[28].mxu0  ;;  %v1366_v63 = vpop.f32.mrb[28].mxu1 }
 0x817   :  { %v1373_v2 = vadd.f32 %v1325_v48, %v1286_v61  ;;  %v1327_v21 = vpop.f32.mrb[29].mxu0  ;;  %v1368_v28 = vpop.f32.mrb[29].mxu1  ;;  %v1375_v9 = vadd.f32 %v1366_v63, %v1288_v30 }
 0x818   :  { %v1374_v38 = vadd.f32 %v1327_v21, %v1287_v62  ;;  %v1329_v40 = vpop.f32.mrb[30].mxu0  ;;  %v1370_v4 = vpop.f32.mrb[30].mxu1  ;;  %v1376_v1 = vadd.f32 %v1368_v28, %v1289_v10 }
 0x819   :  { %v1377_v6 = vmul.f32 0.5, %v1373_v2  ;;  %v1330_v5 = vpop.f32.mrb[31].mxu0  ;;  %v1371_v7 = vpop.f32.mrb[31].mxu1 }
 0x81a   :  { %v1381_v8 = vmul.f32 0.5, %v1374_v38  ;;  %v1386_v29 = vmul.f32 0.5, %v1376_v1 }
 0x81b   :  { %1865 = vtanh.f32 %v1377_v6 }
 0x81c   :  { %1867 = vtanh.f32 %v1381_v8 }
 0x81d   :  { %1869 = vtanh.f32 %v1375_v9 }
 0x81e   :  { %1871 = vtanh.f32 %v1386_v29 }
 0x825   :  { %v1866_v31 = vpop.eup %1865 }
 0x826   :  { %v1868_v26 = vpop.eup %1867  ;;  %v1379_v32 = vmul.f32 0.5, %v1866_v31 }
 0x827   :  { %v1383_v33 = vmul.f32 0.5, %v1868_v26  ;;  %v1870_v35 = vpop.eup %1869 }
 0x828   :  { %v1380_v34 = vadd.f32 0.5, %v1379_v32  ;;  %v1872_v12 = vpop.eup %1871 }
 0x829   :  { %v1384_v36 = vadd.f32 0.5, %v1383_v33  ;;  %v1388_v13 = vmul.f32 0.5, %v1872_v12 }
 0x82a   :  { %v1391_v37 = vmul.f32 %v1870_v35, %v1380_v34 }
 0x82b   :  { %v1390_v3 = vmul.f32 %v1384_v36, %v2581_v15  ;;  %v1389_v14 = vadd.f32 0.5, %v1388_v13 }
 0x82d   :  { %v1392_v11 = vadd.f32 %v1391_v37, %v1390_v3 }
 0x82f   :  { %1873 = vtanh.f32 %v1392_v11 }
 0x839   :  { %v1874_v16 = vpop.eup %1873 }
 0x83a   :  { %v1394_v17 = vmul.f32 %v1874_v16, %v1389_v14 }
 0x83c   :  { %1706 = vmatmul.mubr.f32.vlgmr.msra.gmra.mrb[32].mxu0 %v1394_v17 }
 0x90f   :  { %v1484_v19 = vpop.f32.mrb[32].mxu0 }
 0x910   :  { %v1485_v20 = vadd.f32 %v1639_v18, %v1484_v19  ;;  %v1707_v22 = vpop.f32.mrb[33].mxu0 }
 0x912   :  { %1488 = vst [vmem:[#allocation11] sm:$0xff] %v1485_v20 }
 0x913   :  { %1994 = shalt.err (!%p1991_p3)
}
 0x914   :  { %s1995_s30 = scalar_lea.hbm %s2606_s5, 128 }
 0x915   :  { %p1996_p4 = scmp.ne.s32.totalorder %s2606_s5, %s1995_s30  ;;  %p1999_p5 = scmp.lt.u32.totalorder %s1995_s30, %s2606_s5 }
 0x917   :  { %p2001_p6 = pnand %p1999_p5, %p1996_p4 }
 0x919   :  { %2004 = shalt.err (!%p2001_p6)
}
 0x91a   :  { %1498 = dma.vmem_to_hbm [thread:$0]  %s1496_s26, 128, %s2606_s5, [#allocation7]  }
 0x91b   :  { %2011 = dma.done.wait [#allocation7], 128  }
 0x91c   :  { %2012 = vsyncadd [#allocation7], 4294967168 }
 0x91d   :  { %1502 = vsyncpa [#allocation6], 1 }
 0x91e   :  { %1503 = vsyncpa [#allocation9], 1 }
 0x91f   :  { %1504 = vsyncpa [#allocation7], 1 }

</bundles_post_ra>
